<compile_context>
chip_gen: v7x
topology: tpu7x:2x2x1
jax: 0.10.0
libtpu: 0.0.40
codegen_flags: <defaults>
</compile_context>

<pallas_src>
import functools

import numpy as np
import jax
import jax.numpy as jnp
from jax import lax
from jax.experimental import pallas as pl
from jax.experimental.pallas import tpu as pltpu

_TILE_M = 8192                     # pixels (lane dim) per grid step for big images
_VMEM_LIMIT = 32 * 1024 * 1024     # raises v5e's 16 MiB default; == v6e/v7x default


def _round_up(x, m):
    return (x + m - 1) // m * m


def _tile_m(m):
    if m <= 2048:                  # single resident block, no padding / cropping
        return m
    # >=4 grid steps so v7x's two TensorCores both get work; lane-aligned tiles.
    return int(min(_TILE_M, _round_up(pl.cdiv(m, 4), 512)))


# ----------------------------- Pallas kernels ------------------------------ #

def _mm_kernel(x_ref, w_ref, b_ref, o_ref, *, relu):
    # x: (K, tm) bf16, w: (N, K) bf16 (resident), b: (N, 1) f32 (resident)
    acc = jnp.dot(w_ref[...], x_ref[...], preferred_element_type=jnp.float32)
    acc = acc + b_ref[...]
    if relu:
        acc = jnp.maximum(acc, 0.0)
    o_ref[...] = acc.astype(o_ref.dtype)


def _mm_skip_kernel(x_ref, w_ref, b_ref, s_ref, o_ref, *, relu):
    # fused conv-as-matmul + bias + skip add (+ ReLU); all streams lane-dense.
    acc = jnp.dot(w_ref[...], x_ref[...], preferred_element_type=jnp.float32)
    acc = acc + b_ref[...] + s_ref[...].astype(jnp.float32)
    if relu:
        acc = jnp.maximum(acc, 0.0)
    o_ref[...] = acc.astype(o_ref.dtype)


def _res_kernel(x_ref, w_ref, b_ref, m_ref, o_ref, *, offs, width):
    # Fused residual block: y = mask * relu(conv3x3_s1(x) + b + x).
    # x_ref: (Cin, width + 2*halo) bf16, flattened padded coordinates, resident.
    # The 9 conv taps are static shifted lane-slices (in-kernel im2col: the
    # patch matrix never exists in HBM).
    cout = o_ref.shape[0]
    acc = jnp.zeros((cout, width), jnp.float32)
    for t, off in enumerate(offs):
        acc = acc + jnp.dot(w_ref[t], x_ref[:, off:off + width],
                            preferred_element_type=jnp.float32)
    center = x_ref[:, offs[4]:offs[4] + width].astype(jnp.float32)   # residual = center tap
    y = jnp.maximum(acc + b_ref[...] + center, 0.0)
    o_ref[...] = (y * m_ref[...]).astype(o_ref.dtype)


# ---------------------------- kernel wrappers ------------------------------ #

def _conv_matmul_cm(patches, w2d, bias, skip=None, relu=True,
                    out_dtype=jnp.bfloat16):
    """Channel-major conv-as-matmul: out(N,M) = w(N,K) @ patches(K,M) [+skip][+relu].

    M (the pixel axis) is the lane dimension -> lane-dense loads/stores.
    Weights and bias stay VMEM-resident across the M grid; patches/skip/out
    stream through VMEM in (·, tm) blocks (auto double-buffered).
    """
    K, M = patches.shape
    N = w2d.shape[0]

    patches = patches.astype(jnp.bfloat16)
    w2d = w2d.astype(jnp.bfloat16)
    b2d = bias.reshape(N, 1).astype(jnp.float32)

    tm = _tile_m(M)
    grid = (pl.cdiv(M, tm),)
    x_spec = pl.BlockSpec((K, tm), lambda i: (0, i))
    w_spec = pl.BlockSpec((N, K), lambda i: (0, 0))     # resident
    b_spec = pl.BlockSpec((N, 1), lambda i: (0, 0))     # resident
    o_spec = pl.BlockSpec((N, tm), lambda i: (0, i))
    out_shape = jax.ShapeDtypeStruct((N, M), out_dtype)
    cparams = pltpu.CompilerParams(dimension_semantics=("parallel",),
                                   vmem_limit_bytes=_VMEM_LIMIT)

    if skip is None:
        return pl.pallas_call(
            functools.partial(_mm_kernel, relu=relu),
            grid=grid,
            in_specs=[x_spec, w_spec, b_spec],
            out_specs=o_spec,
            out_shape=out_shape,
            compiler_params=cparams,
        )(patches, w2d, b2d)

    s_spec = pl.BlockSpec((N, tm), lambda i: (0, i))
    return pl.pallas_call(
        functools.partial(_mm_skip_kernel, relu=relu),
        grid=grid,
        in_specs=[x_spec, w_spec, b_spec, s_spec],
        out_specs=o_spec,
        out_shape=out_shape,
        compiler_params=cparams,
    )(patches, w2d, b2d, skip.astype(jnp.bfloat16))


def residual_block_3x3(x_cm, w_oihw, bias, B, H, W, out_dtype=jnp.bfloat16):
    """relu(x + conv3x3_stride1(x)) fused in one Pallas kernel (in-kernel im2col).

    x_cm: (C, B*H*W).  Returns (Cout, B*(H+2)*(W+2)) in *padded* flat
    coordinates with a zeroed 1-pixel border, which the following up-conv patch
    build consumes directly (no un-pad copy).
    """
    C = x_cm.shape[0]
    cout = w_oihw.shape[0]
    Hp, Wp = H + 2, W + 2
    S = Wp + 1                      # halo so all 9 flat tap shifts are >= 0
    Mp = B * Hp * Wp

    xp = jnp.pad(x_cm.reshape(C, B, H, W), ((0, 0), (0, 0), (1, 1), (1, 1)))
    xe = jnp.pad(xp.reshape(C, Mp), ((0, 0), (S, S))).astype(jnp.bfloat16)

    # (9, Cout, Cin): one (Cout, Cin) slab per tap, taps ordered (dy, dx).
    w9 = jnp.transpose(w_oihw, (2, 3, 0, 1)).reshape(9, cout, C).astype(jnp.bfloat16)
    b2d = bias.reshape(cout, 1).astype(jnp.float32)

    m2d = jnp.zeros((Hp, Wp), jnp.float32).at[1:1 + H, 1:1 + W].set(1.0)
    mask = jnp.tile(m2d.reshape(-1), (B,)).reshape(1, Mp)

    offs = tuple(dy * Wp + dx for dy in range(3) for dx in range(3))
    cparams = pltpu.CompilerParams(dimension_semantics=("arbitrary",),
                                   vmem_limit_bytes=_VMEM_LIMIT)
    return pl.pallas_call(
        functools.partial(_res_kernel, offs=offs, width=Mp),
        grid=(1,),
        in_specs=[pl.BlockSpec((C, Mp + 2 * S), lambda i: (0, 0)),
                  pl.BlockSpec((9, cout, C), lambda i: (0, 0, 0)),
                  pl.BlockSpec((cout, 1), lambda i: (0, 0)),
                  pl.BlockSpec((1, Mp), lambda i: (0, 0))],
        out_specs=pl.BlockSpec((cout, Mp), lambda i: (0, 0)),
        out_shape=jax.ShapeDtypeStruct((cout, Mp), out_dtype),
        compiler_params=cparams,
    )(xe, w9, b2d, mask)


# ------------------------- layout / weight helpers ------------------------- #

def _conv_w_cm(w_oihw):
    """(Cout, Cin, 3, 3) -> (Cout, 9*Cin), cols ordered (dy, dx, cin)."""
    cout, cin = w_oihw.shape[0], w_oihw.shape[1]
    return jnp.transpose(w_oihw, (0, 2, 3, 1)).reshape(cout, 9 * cin)


def _strided_conv_patches(x_cm, B, H, W, stride):
    """Channel-major im2col for a 3x3 conv, padding 1.
    x_cm: (C, B*H*W) -> ((9*C, B*Ho*Wo), Ho, Wo); K ordered (dy, dx, c)."""
    C = x_cm.shape[0]
    Ho = (H - 1) // stride + 1
    Wo = (W - 1) // stride + 1
    xp = jnp.pad(x_cm.reshape(C, B, H, W), ((0, 0), (0, 0), (1, 1), (1, 1)))
    taps = [xp[:, :, dy:dy + stride * (Ho - 1) + 1:stride,
                     dx:dx + stride * (Wo - 1) + 1:stride]
            for dy in range(3) for dx in range(3)]
    return jnp.concatenate(taps, axis=0).reshape(9 * C, B * Ho * Wo), Ho, Wo


def _deconv_patches(x_cm, B, H, W):
    """2x2-neighborhood patches (bottom/right zero pad) for the polyphase
    stride-2 up-conv.  (C, B*H*W) -> (4*C, B*H*W), K ordered (dy, dx, c)."""
    C = x_cm.shape[0]
    xr = jnp.pad(x_cm.reshape(C, B, H, W), ((0, 0), (0, 0), (0, 1), (0, 1)))
    taps = [xr[:, :, dy:dy + H, dx:dx + W] for dy in range(2) for dx in range(2)]
    return jnp.concatenate(taps, axis=0).reshape(4 * C, B * H * W)


def _deconv_patches_from_padded(xpad_cm, B, H, W):
    """Same, but reading an activation stored in padded (H+2, W+2) coordinates
    with a zeroed border (output of residual_block_3x3): no extra pad copy."""
    C = xpad_cm.shape[0]
    xr = xpad_cm.reshape(C, B, H + 2, W + 2)
    taps = [xr[:, :, 1 + dy:1 + dy + H, 1 + dx:1 + dx + W]
            for dy in range(2) for dx in range(2)]
    return jnp.concatenate(taps, axis=0).reshape(4 * C, B * H * W)


# 1-D polyphase taps of ConvTranspose(k=3, stride=2, padding=1, output_padding=1):
#   y[2m]   = x[m] * w[1]
#   y[2m+1] = x[m] * w[2] + x[m+1] * w[0]
# _G1[r, d, k] = 1 iff output parity r reads input offset d through kernel tap k.
_G1 = np.zeros((2, 2, 3), np.float32)
_G1[0, 0, 1] = 1.0
_G1[1, 0, 2] = 1.0
_G1[1, 1, 0] = 1.0

# Same relation composed over a 2-phase-packed input: output phase p (of 4, over
# the /4 grid) reads packed block offset D, packed parity r, kernel tap k.
_G4 = np.zeros((4, 2, 2, 3), np.float32)
for _p in range(4):
    _q, _s = _p // 2, _p % 2
    for _d in range(2):
        for _k in range(3):
            if _G1[_s, _d, _k]:
                _t = _q + _d
                _G4[_p, _t // 2, _t % 2, _k] = 1.0


def _deconv_w_poly(wt_iohw):
    """ConvTranspose2d weight (Cin, Cout, 3, 3) -> (4*Cout, 4*Cin).
    Rows (ry, rx, cout) = output phases; cols (dy, dx, cin) match _deconv_patches."""
    cin, cout = wt_iohw.shape[0], wt_iohw.shape[1]
    w = jnp.einsum('rdk,sel,cokl->rsodec', _G1, _G1, wt_iohw)
    return w.reshape(4 * cout, 4 * cin)


def _deconv_w_poly_packed_in(wt_iohw):
    """Up-conv applied directly to a 2x2-phase-packed input (u1 kept packed):
    (Cin, Cout, 3, 3) -> (16*Cout, 16*Cin).
    Rows (py, px, cout) = 4x4 output phases over the /4 grid; cols
    (Dy, Dx, ry, rx, cin) match _deconv_patches of the packed activation."""
    cin, cout = wt_iohw.shape[0], wt_iohw.shape[1]
    w = jnp.einsum('pdrk,qesl,cokl->pqodersc', _G4, _G4, wt_iohw)
    return w.reshape(16 * cout, 16 * cin)


def _pack_phases(x_cm, B, H, W):
    """(C, B*H*W) -> (4*C, B*(H//2)*(W//2)); rows ordered (ry, rx, c)."""
    C = x_cm.shape[0]
    xr = x_cm.reshape(C, B, H // 2, 2, W // 2, 2)
    return jnp.transpose(xr, (3, 5, 0, 1, 2, 4)).reshape(
        4 * C, B * (H // 2) * (W // 2))


def _unpack_phases4(y_pm, B, H4, W4, C):
    """(16*C, B*H4*W4) rows (py, px, c) -> (B, C, 4*H4, 4*W4) (NCHW)."""
    yr = y_pm.reshape(4, 4, C, B, H4, W4)
    return jnp.transpose(yr, (3, 2, 4, 0, 5, 1)).reshape(B, C, 4 * H4, 4 * W4)


# --------------------------------- FCN model -------------------------------- #

def init_params(key):
    def kaiming(k, shape, fan_in):
        return jax.random.normal(k, shape, jnp.float32) * jnp.sqrt(2.0 / fan_in)

    ks = jax.random.split(key, 5)
    return {
        "mean": jnp.array([0.485, 0.456, 0.406], jnp.float32),
        "std": jnp.array([0.229, 0.224, 0.225], jnp.float32),
        # Conv2d layout (Cout, Cin, kH, kW)
        "c1_w": kaiming(ks[0], (16, 3, 3, 3), 3 * 9),   "c1_b": jnp.zeros((16,), jnp.float32),
        "c2_w": kaiming(ks[1], (32, 16, 3, 3), 16 * 9), "c2_b": jnp.zeros((32,), jnp.float32),
        "c3_w": kaiming(ks[2], (32, 32, 3, 3), 32 * 9), "c3_b": jnp.zeros((32,), jnp.float32),
        # ConvTranspose2d layout (Cin, Cout, kH, kW)
        "u1_w": kaiming(ks[3], (32, 16, 3, 3), 32 * 9), "u1_b": jnp.zeros((16,), jnp.float32),
        "u2_w": kaiming(ks[4], (16, 6, 3, 3), 16 * 9),  "u2_b": jnp.zeros((6,), jnp.float32),
    }


def fcn_forward(params, x_nchw):
    """x: (B, 3, H, W) float -> (B, 6, H, W) float32."""
    B, _, H, W = x_nchw.shape
    # Same constraint as the PyTorch skip architecture (explicit per review).
    assert H % 4 == 0 and W % 4 == 0, "FCN skip connections need H, W divisible by 4"
    H2, W2 = H // 2, W // 2
    H4, W4 = H2 // 2, W2 // 2

    # Channel-major activations (C, B*H*W); normalization folded into c1:
    # conv((x-mean)/std, w1) == conv(x-mean, w1/std) (exact incl. zero padding).
    x = jnp.transpose(x_nchw, (1, 0, 2, 3)).astype(jnp.float32)
    x = (x - params["mean"].reshape(3, 1, 1, 1)).reshape(3, B * H * W).astype(jnp.bfloat16)
    w1 = params["c1_w"] / params["std"][None, :, None, None]

    # ---- encoder ----
    p1, _, _ = _strided_conv_patches(x, B, H, W, 2)                         # (27,  B*H2*W2)
    d1 = _conv_matmul_cm(p1, _conv_w_cm(w1), params["c1_b"])                # (16,  B*H2*W2)

    p2, _, _ = _strided_conv_patches(d1, B, H2, W2, 2)                      # (144, B*H4*W4)
    d2 = _conv_matmul_cm(p2, _conv_w_cm(params["c2_w"]), params["c2_b"])    # (32,  B*H4*W4)

    # ---- residual block: fused kernel, im2col built in-kernel ----
    d2r = residual_block_3x3(d2, params["c3_w"], params["c3_b"], B, H4, W4)  # padded coords

    # ---- decoder: zero-free polyphase up-convs; u1 stays phase-packed ----
    pu1 = _deconv_patches_from_padded(d2r, B, H4, W4)                       # (128, B*H4*W4)
    skip1 = _pack_phases(d1, B, H2, W2)                                     # (64,  B*H4*W4)
    u1p = _conv_matmul_cm(pu1, _deconv_w_poly(params["u1_w"]),
                          jnp.tile(params["u1_b"], 4), skip=skip1)          # (64,  B*H4*W4)

    pu2 = _deconv_patches(u1p, B, H4, W4)                                   # (256, B*H4*W4)
    u2p = _conv_matmul_cm(pu2, _deconv_w_poly_packed_in(params["u2_w"]),
                          jnp.tile(params["u2_b"], 16), relu=False,
                          out_dtype=jnp.float32)                            # (96,  B*H4*W4)

    out = _unpack_phases4(u2p, B, H4, W4, 6)                                # (B, 6, H, W)
    return out[:, :, :H, :W]


# ----------------------------- f32 XLA reference ---------------------------- #

def _ref_conv(x, w, b, stride):
    y = lax.conv_general_dilated(x, w, (stride, stride), [(1, 1), (1, 1)],
                                 dimension_numbers=("NHWC", "OIHW", "NHWC"))
    return y + b


def _ref_deconv(x, wt, b):
    B, H, W, C = x.shape
    xd = jnp.zeros((B, 2 * H - 1, 2 * W - 1, C), x.dtype).at[:, ::2, ::2, :].set(x)
    xp = jnp.pad(xd, ((0, 0), (1, 2), (1, 2), (0, 0)))
    wc = jnp.transpose(wt[:, :, ::-1, ::-1], (1, 0, 2, 3))
    y = lax.conv_general_dilated(xp, wc, (1, 1), [(0, 0), (0, 0)],
                                 dimension_numbers=("NHWC", "OIHW", "NHWC"))
    return y + b


def fcn_reference(params, x_nchw):
    B, C, H, W = x_nchw.shape
    x = jnp.transpose(x_nchw, (0, 2, 3, 1)).astype(jnp.float32)
    xn = (x - params["mean"]) / params["std"]
    d1 = jax.nn.relu(_ref_conv(xn, params["c1_w"], params["c1_b"], 2))
    d2 = jax.nn.relu(_ref_conv(d1, params["c2_w"], params["c2_b"], 2))
    d2 = jax.nn.relu(_ref_conv(d2, params["c3_w"], params["c3_b"], 1) + d2)
    u1 = jax.nn.relu(_ref_deconv(d2, params["u1_w"], params["u1_b"]) + d1)
    u2 = _ref_deconv(u1, params["u2_w"], params["u2_b"])[:, :H, :W, :]
    return jnp.transpose(u2, (0, 3, 1, 2))


if __name__ == "__main__":
    key = jax.random.PRNGKey(0)
    pkey, xkey = jax.random.split(key)
    params = init_params(pkey)
    x = jax.random.normal(xkey, (2, 3, 16, 16), jnp.float32)   # (B, 3, H, W)

    fwd = jax.jit(fcn_forward)
    out = jax.block_until_ready(fwd(params, x))
    assert out.shape == (2, 6, 16, 16), out.shape
    assert out.dtype == jnp.float32, out.dtype
    assert bool(jnp.all(jnp.isfinite(out)))

    # sanity check against a pure-XLA f32 reference (bf16 streams -> loose tol)
    ref = jax.block_until_ready(jax.jit(fcn_reference)(params, x))
    rel = float(jnp.max(jnp.abs(out - ref)) / (jnp.max(jnp.abs(ref)) + 1e-6))
    assert rel < 0.1, f"mismatch vs f32 reference: rel={rel}"

    print("KERNEL_OK")
</pallas_src>

<mosaic_0001>
module attributes {stable_mosaic.version = 11 : i64} {
  func.func @_mm_kernel(%arg0: i32, %arg1: memref<27x128xbf16, #tpu.memory_space<vmem>>, %arg2: memref<16x27xbf16, #tpu.memory_space<vmem>>, %arg3: memref<16x1xf32, #tpu.memory_space<vmem>>, %arg4: memref<16x128xbf16, #tpu.memory_space<vmem>>) attributes {dimension_semantics = [#tpu.dimension_semantics<parallel>], iteration_bounds = array<i64: 1>, scalar_prefetch = 0 : i64, scratch_operands = 0 : i64, tpu.core_type = #tpu.core_type<tc>, window_params = [{transform_indices = @transform_0, window_bounds = array<i64: 27, 128>}, {pipeline_mode = #tpu.pipeline_mode<synchronous>, transform_indices = @transform_1, window_bounds = array<i64: 16, 27>}, {pipeline_mode = #tpu.pipeline_mode<synchronous>, transform_indices = @transform_2, window_bounds = array<i64: 16, 1>}, {transform_indices = @transform_3, window_bounds = array<i64: 16, 128>}]} {
    %c0 = arith.constant 0 : index
    %c0_0 = arith.constant 0 : index
    %0 = vector.load %arg2[%c0, %c0_0] : memref<16x27xbf16, #tpu.memory_space<vmem>>, vector<16x27xbf16>
    %c0_1 = arith.constant 0 : index
    %c0_2 = arith.constant 0 : index
    %1 = vector.load %arg1[%c0_1, %c0_2] : memref<27x128xbf16, #tpu.memory_space<vmem>>, vector<27x128xbf16>
    %cst = arith.constant dense<0.000000e+00> : vector<16x128xf32>
    %2 = tpu.matmul %0, %1, %cst {dimension_numbers = #tpu.dot_dimension_numbers<[1], [0], [0], [1], [0, 0, 1, 1], [], []>} : vector<16x27xbf16>, vector<27x128xbf16>, vector<16x128xf32> -> vector<16x128xf32>
    %c0_3 = arith.constant 0 : index
    %c0_4 = arith.constant 0 : index
    %3 = vector.load %arg3[%c0_3, %c0_4] : memref<16x1xf32, #tpu.memory_space<vmem>>, vector<16x1xf32>
    %4 = vector.broadcast %3 : vector<16x1xf32> to vector<16x128xf32>
    %5 = arith.addf %2, %4 : vector<16x128xf32>
    %cst_5 = arith.constant 0.000000e+00 : f32
    %6 = vector.broadcast %cst_5 : f32 to vector<16x128xf32>
    %7 = arith.maximumf %5, %6 : vector<16x128xf32>
    %8 = arith.truncf %7 : vector<16x128xf32> to vector<16x128xbf16>
    %c0_6 = arith.constant 0 : index
    %c0_7 = arith.constant 0 : index
    %9 = vector.load %arg4[%c0_6, %c0_7] : memref<16x128xbf16, #tpu.memory_space<vmem>>, vector<16x128xbf16>
    tpu.vector_store %arg4[%c0_6, %c0_7], %8 {strides = array<i32>} : memref<16x128xbf16, #tpu.memory_space<vmem>>, vector<16x128xbf16>,
    return
  }
  func.func @transform_0(%arg0: i32) -> (i32, i32) {
    %c0_i32 = arith.constant 0 : i32
    %c0_i32_0 = arith.constant 0 : i32
    return %c0_i32, %arg0 : i32, i32
  }
  func.func @transform_1(%arg0: i32) -> (i32, i32) {
    %c0_i32 = arith.constant 0 : i32
    %c0_i32_0 = arith.constant 0 : i32
    %c0_i32_1 = arith.constant 0 : i32
    return %c0_i32, %c0_i32_0 : i32, i32
  }
  func.func @transform_2(%arg0: i32) -> (i32, i32) {
    %c0_i32 = arith.constant 0 : i32
    %c0_i32_0 = arith.constant 0 : i32
    %c0_i32_1 = arith.constant 0 : i32
    return %c0_i32, %c0_i32_0 : i32, i32
  }
  func.func @transform_3(%arg0: i32) -> (i32, i32) {
    %c0_i32 = arith.constant 0 : i32
    %c0_i32_0 = arith.constant 0 : i32
    return %c0_i32, %arg0 : i32, i32
  }
}

module attributes {stable_mosaic.version = 11 : i64} {
  func.func @_mm_kernel(%arg0: i32, %arg1: memref<144x32xbf16, #tpu.memory_space<vmem>>, %arg2: memref<32x144xbf16, #tpu.memory_space<vmem>>, %arg3: memref<32x1xf32, #tpu.memory_space<vmem>>, %arg4: memref<32x32xbf16, #tpu.memory_space<vmem>>) attributes {dimension_semantics = [#tpu.dimension_semantics<parallel>], iteration_bounds = array<i64: 1>, scalar_prefetch = 0 : i64, scratch_operands = 0 : i64, tpu.core_type = #tpu.core_type<tc>, window_params = [{transform_indices = @transform_0, window_bounds = array<i64: 144, 32>}, {pipeline_mode = #tpu.pipeline_mode<synchronous>, transform_indices = @transform_1, window_bounds = array<i64: 32, 144>}, {pipeline_mode = #tpu.pipeline_mode<synchronous>, transform_indices = @transform_2, window_bounds = array<i64: 32, 1>}, {transform_indices = @transform_3, window_bounds = array<i64: 32, 32>}]} {
    %c0 = arith.constant 0 : index
    %c0_0 = arith.constant 0 : index
    %0 = vector.load %arg2[%c0, %c0_0] : memref<32x144xbf16, #tpu.memory_space<vmem>>, vector<32x144xbf16>
    %c0_1 = arith.constant 0 : index
    %c0_2 = arith.constant 0 : index
    %1 = vector.load %arg1[%c0_1, %c0_2] : memref<144x32xbf16, #tpu.memory_space<vmem>>, vector<144x32xbf16>
    %cst = arith.constant dense<0.000000e+00> : vector<32x32xf32>
    %2 = tpu.matmul %0, %1, %cst {dimension_numbers = #tpu.dot_dimension_numbers<[1], [0], [0], [1], [0, 0, 1, 1], [], []>} : vector<32x144xbf16>, vector<144x32xbf16>, vector<32x32xf32> -> vector<32x32xf32>
    %c0_3 = arith.constant 0 : index
    %c0_4 = arith.constant 0 : index
    %3 = vector.load %arg3[%c0_3, %c0_4] : memref<32x1xf32, #tpu.memory_space<vmem>>, vector<32x1xf32>
    %4 = vector.broadcast %3 : vector<32x1xf32> to vector<32x32xf32>
    %5 = arith.addf %2, %4 : vector<32x32xf32>
    %cst_5 = arith.constant 0.000000e+00 : f32
    %6 = vector.broadcast %cst_5 : f32 to vector<32x32xf32>
    %7 = arith.maximumf %5, %6 : vector<32x32xf32>
    %8 = arith.truncf %7 : vector<32x32xf32> to vector<32x32xbf16>
    %c0_6 = arith.constant 0 : index
    %c0_7 = arith.constant 0 : index
    %9 = vector.load %arg4[%c0_6, %c0_7] : memref<32x32xbf16, #tpu.memory_space<vmem>>, vector<32x32xbf16>
    tpu.vector_store %arg4[%c0_6, %c0_7], %8 {strides = array<i32>} : memref<32x32xbf16, #tpu.memory_space<vmem>>, vector<32x32xbf16>,
    return
  }
  func.func @transform_0(%arg0: i32) -> (i32, i32) {
    %c0_i32 = arith.constant 0 : i32
    %c0_i32_0 = arith.constant 0 : i32
    return %c0_i32, %arg0 : i32, i32
  }
  func.func @transform_1(%arg0: i32) -> (i32, i32) {
    %c0_i32 = arith.constant 0 : i32
    %c0_i32_0 = arith.constant 0 : i32
    %c0_i32_1 = arith.constant 0 : i32
    return %c0_i32, %c0_i32_0 : i32, i32
  }
  func.func @transform_2(%arg0: i32) -> (i32, i32) {
    %c0_i32 = arith.constant 0 : i32
    %c0_i32_0 = arith.constant 0 : i32
    %c0_i32_1 = arith.constant 0 : i32
    return %c0_i32, %c0_i32_0 : i32, i32
  }
  func.func @transform_3(%arg0: i32) -> (i32, i32) {
    %c0_i32 = arith.constant 0 : i32
    %c0_i32_0 = arith.constant 0 : i32
    return %c0_i32, %arg0 : i32, i32
  }
}

module attributes {stable_mosaic.version = 11 : i64} {
  func.func @_res_kernel(%arg0: i32, %arg1: memref<32x86xbf16, #tpu.memory_space<vmem>>, %arg2: memref<9x32x32xbf16, #tpu.memory_space<vmem>>, %arg3: memref<32x1xf32, #tpu.memory_space<vmem>>, %arg4: memref<1x72xf32, #tpu.memory_space<vmem>>, %arg5: memref<32x72xbf16, #tpu.memory_space<vmem>>) attributes {dimension_semantics = [#tpu.dimension_semantics<arbitrary>], iteration_bounds = array<i64: 1>, scalar_prefetch = 0 : i64, scratch_operands = 0 : i64, tpu.core_type = #tpu.core_type<tc>, window_params = [{pipeline_mode = #tpu.pipeline_mode<synchronous>, transform_indices = @transform_0, window_bounds = array<i64: 32, 86>}, {pipeline_mode = #tpu.pipeline_mode<synchronous>, transform_indices = @transform_1, window_bounds = array<i64: 9, 32, 32>}, {pipeline_mode = #tpu.pipeline_mode<synchronous>, transform_indices = @transform_2, window_bounds = array<i64: 32, 1>}, {pipeline_mode = #tpu.pipeline_mode<synchronous>, transform_indices = @transform_3, window_bounds = array<i64: 1, 72>}, {pipeline_mode = #tpu.pipeline_mode<synchronous>, transform_indices = @transform_4, window_bounds = array<i64: 32, 72>}]} {
    %cst = arith.constant 0.000000e+00 : f32
    %0 = vector.broadcast %cst : f32 to vector<32x72xf32>
    %c0 = arith.constant 0 : index
    %c0_0 = arith.constant 0 : index
    %c0_1 = arith.constant 0 : index
    %1 = vector.load %arg2[%c0, %c0_0, %c0_1] : memref<9x32x32xbf16, #tpu.memory_space<vmem>>, vector<1x32x32xbf16>
    %2 = vector.shape_cast %1 : vector<1x32x32xbf16> to vector<32x32xbf16>
    %c0_2 = arith.constant 0 : index
    %c0_3 = arith.constant 0 : index
    %3 = vector.load %arg1[%c0_2, %c0_3] : memref<32x86xbf16, #tpu.memory_space<vmem>>, vector<32x72xbf16>
    %cst_4 = arith.constant dense<0.000000e+00> : vector<32x72xf32>
    %4 = tpu.matmul %2, %3, %cst_4 {dimension_numbers = #tpu.dot_dimension_numbers<[1], [0], [0], [1], [0, 0, 1, 1], [], []>} : vector<32x32xbf16>, vector<32x72xbf16>, vector<32x72xf32> -> vector<32x72xf32>
    %5 = arith.addf %0, %4 : vector<32x72xf32>
    %c1 = arith.constant 1 : index
    %c0_5 = arith.constant 0 : index
    %c0_6 = arith.constant 0 : index
    %6 = vector.load %arg2[%c1, %c0_5, %c0_6] : memref<9x32x32xbf16, #tpu.memory_space<vmem>>, vector<1x32x32xbf16>
    %7 = vector.shape_cast %6 : vector<1x32x32xbf16> to vector<32x32xbf16>
    %c0_7 = arith.constant 0 : index
    %c1_8 = arith.constant 1 : index
    %8 = vector.load %arg1[%c0_7, %c1_8] : memref<32x86xbf16, #tpu.memory_space<vmem>>, vector<32x72xbf16>
    %cst_9 = arith.constant dense<0.000000e+00> : vector<32x72xf32>
    %9 = tpu.matmul %7, %8, %cst_9 {dimension_numbers = #tpu.dot_dimension_numbers<[1], [0], [0], [1], [0, 0, 1, 1], [], []>} : vector<32x32xbf16>, vector<32x72xbf16>, vector<32x72xf32> -> vector<32x72xf32>
    %10 = arith.addf %5, %9 : vector<32x72xf32>
    %c2 = arith.constant 2 : index
    %c0_10 = arith.constant 0 : index
    %c0_11 = arith.constant 0 : index
    %11 = vector.load %arg2[%c2, %c0_10, %c0_11] : memref<9x32x32xbf16, #tpu.memory_space<vmem>>, vector<1x32x32xbf16>
    %12 = vector.shape_cast %11 : vector<1x32x32xbf16> to vector<32x32xbf16>
    %c0_12 = arith.constant 0 : index
    %c2_13 = arith.constant 2 : index
    %13 = vector.load %arg1[%c0_12, %c2_13] : memref<32x86xbf16, #tpu.memory_space<vmem>>, vector<32x72xbf16>
    %cst_14 = arith.constant dense<0.000000e+00> : vector<32x72xf32>
    %14 = tpu.matmul %12, %13, %cst_14 {dimension_numbers = #tpu.dot_dimension_numbers<[1], [0], [0], [1], [0, 0, 1, 1], [], []>} : vector<32x32xbf16>, vector<32x72xbf16>, vector<32x72xf32> -> vector<32x72xf32>
    %15 = arith.addf %10, %14 : vector<32x72xf32>
    %c3 = arith.constant 3 : index
    %c0_15 = arith.constant 0 : index
    %c0_16 = arith.constant 0 : index
    %16 = vector.load %arg2[%c3, %c0_15, %c0_16] : memref<9x32x32xbf16, #tpu.memory_space<vmem>>, vector<1x32x32xbf16>
    %17 = vector.shape_cast %16 : vector<1x32x32xbf16> to vector<32x32xbf16>
    %c0_17 = arith.constant 0 : index
    %c6 = arith.constant 6 : index
    %18 = vector.load %arg1[%c0_17, %c6] : memref<32x86xbf16, #tpu.memory_space<vmem>>, vector<32x72xbf16>
    %cst_18 = arith.constant dense<0.000000e+00> : vector<32x72xf32>
    %19 = tpu.matmul %17, %18, %cst_18 {dimension_numbers = #tpu.dot_dimension_numbers<[1], [0], [0], [1], [0, 0, 1, 1], [], []>} : vector<32x32xbf16>, vector<32x72xbf16>, vector<32x72xf32> -> vector<32x72xf32>
    %20 = arith.addf %15, %19 : vector<32x72xf32>
    %c4 = arith.constant 4 : index
    %c0_19 = arith.constant 0 : index
    %c0_20 = arith.constant 0 : index
    %21 = vector.load %arg2[%c4, %c0_19, %c0_20] : memref<9x32x32xbf16, #tpu.memory_space<vmem>>, vector<1x32x32xbf16>
    %22 = vector.shape_cast %21 : vector<1x32x32xbf16> to vector<32x32xbf16>
    %c0_21 = arith.constant 0 : index
    %c7 = arith.constant 7 : index
    %23 = vector.load %arg1[%c0_21, %c7] : memref<32x86xbf16, #tpu.memory_space<vmem>>, vector<32x72xbf16>
    %cst_22 = arith.constant dense<0.000000e+00> : vector<32x72xf32>
    %24 = tpu.matmul %22, %23, %cst_22 {dimension_numbers = #tpu.dot_dimension_numbers<[1], [0], [0], [1], [0, 0, 1, 1], [], []>} : vector<32x32xbf16>, vector<32x72xbf16>, vector<32x72xf32> -> vector<32x72xf32>
    %25 = arith.addf %20, %24 : vector<32x72xf32>
    %c5 = arith.constant 5 : index
    %c0_23 = arith.constant 0 : index
    %c0_24 = arith.constant 0 : index
    %26 = vector.load %arg2[%c5, %c0_23, %c0_24] : memref<9x32x32xbf16, #tpu.memory_space<vmem>>, vector<1x32x32xbf16>
    %27 = vector.shape_cast %26 : vector<1x32x32xbf16> to vector<32x32xbf16>
    %c0_25 = arith.constant 0 : index
    %c8 = arith.constant 8 : index
    %28 = vector.load %arg1[%c0_25, %c8] : memref<32x86xbf16, #tpu.memory_space<vmem>>, vector<32x72xbf16>
    %cst_26 = arith.constant dense<0.000000e+00> : vector<32x72xf32>
    %29 = tpu.matmul %27, %28, %cst_26 {dimension_numbers = #tpu.dot_dimension_numbers<[1], [0], [0], [1], [0, 0, 1, 1], [], []>} : vector<32x32xbf16>, vector<32x72xbf16>, vector<32x72xf32> -> vector<32x72xf32>
    %30 = arith.addf %25, %29 : vector<32x72xf32>
    %c6_27 = arith.constant 6 : index
    %c0_28 = arith.constant 0 : index
    %c0_29 = arith.constant 0 : index
    %31 = vector.load %arg2[%c6_27, %c0_28, %c0_29] : memref<9x32x32xbf16, #tpu.memory_space<vmem>>, vector<1x32x32xbf16>
    %32 = vector.shape_cast %31 : vector<1x32x32xbf16> to vector<32x32xbf16>
    %c0_30 = arith.constant 0 : index
    %c12 = arith.constant 12 : index
    %33 = vector.load %arg1[%c0_30, %c12] : memref<32x86xbf16, #tpu.memory_space<vmem>>, vector<32x72xbf16>
    %cst_31 = arith.constant dense<0.000000e+00> : vector<32x72xf32>
    %34 = tpu.matmul %32, %33, %cst_31 {dimension_numbers = #tpu.dot_dimension_numbers<[1], [0], [0], [1], [0, 0, 1, 1], [], []>} : vector<32x32xbf16>, vector<32x72xbf16>, vector<32x72xf32> -> vector<32x72xf32>
    %35 = arith.addf %30, %34 : vector<32x72xf32>
    %c7_32 = arith.constant 7 : index
    %c0_33 = arith.constant 0 : index
    %c0_34 = arith.constant 0 : index
    %36 = vector.load %arg2[%c7_32, %c0_33, %c0_34] : memref<9x32x32xbf16, #tpu.memory_space<vmem>>, vector<1x32x32xbf16>
    %37 = vector.shape_cast %36 : vector<1x32x32xbf16> to vector<32x32xbf16>
    %c0_35 = arith.constant 0 : index
    %c13 = arith.constant 13 : index
    %38 = vector.load %arg1[%c0_35, %c13] : memref<32x86xbf16, #tpu.memory_space<vmem>>, vector<32x72xbf16>
    %cst_36 = arith.constant dense<0.000000e+00> : vector<32x72xf32>
    %39 = tpu.matmul %37, %38, %cst_36 {dimension_numbers = #tpu.dot_dimension_numbers<[1], [0], [0], [1], [0, 0, 1, 1], [], []>} : vector<32x32xbf16>, vector<32x72xbf16>, vector<32x72xf32> -> vector<32x72xf32>
    %40 = arith.addf %35, %39 : vector<32x72xf32>
    %c8_37 = arith.constant 8 : index
    %c0_38 = arith.constant 0 : index
    %c0_39 = arith.constant 0 : index
    %41 = vector.load %arg2[%c8_37, %c0_38, %c0_39] : memref<9x32x32xbf16, #tpu.memory_space<vmem>>, vector<1x32x32xbf16>
    %42 = vector.shape_cast %41 : vector<1x32x32xbf16> to vector<32x32xbf16>
    %c0_40 = arith.constant 0 : index
    %c14 = arith.constant 14 : index
    %43 = vector.load %arg1[%c0_40, %c14] : memref<32x86xbf16, #tpu.memory_space<vmem>>, vector<32x72xbf16>
    %cst_41 = arith.constant dense<0.000000e+00> : vector<32x72xf32>
    %44 = tpu.matmul %42, %43, %cst_41 {dimension_numbers = #tpu.dot_dimension_numbers<[1], [0], [0], [1], [0, 0, 1, 1], [], []>} : vector<32x32xbf16>, vector<32x72xbf16>, vector<32x72xf32> -> vector<32x72xf32>
    %45 = arith.addf %40, %44 : vector<32x72xf32>
    %c0_42 = arith.constant 0 : index
    %c7_43 = arith.constant 7 : index
    %46 = vector.load %arg1[%c0_42, %c7_43] : memref<32x86xbf16, #tpu.memory_space<vmem>>, vector<32x72xbf16>
    %47 = arith.extf %46 : vector<32x72xbf16> to vector<32x72xf32>
    %c0_44 = arith.constant 0 : index
    %c0_45 = arith.constant 0 : index
    %48 = vector.load %arg3[%c0_44, %c0_45] : memref<32x1xf32, #tpu.memory_space<vmem>>, vector<32x1xf32>
    %49 = vector.broadcast %48 : vector<32x1xf32> to vector<32x72xf32>
    %50 = arith.addf %45, %49 : vector<32x72xf32>
    %51 = arith.addf %50, %47 : vector<32x72xf32>
    %cst_46 = arith.constant 0.000000e+00 : f32
    %52 = vector.broadcast %cst_46 : f32 to vector<32x72xf32>
    %53 = arith.maximumf %51, %52 : vector<32x72xf32>
    %c0_47 = arith.constant 0 : index
    %c0_48 = arith.constant 0 : index
    %54 = vector.load %arg4[%c0_47, %c0_48] : memref<1x72xf32, #tpu.memory_space<vmem>>, vector<1x72xf32>
    %55 = vector.broadcast %54 : vector<1x72xf32> to vector<32x72xf32>
    %56 = arith.mulf %53, %55 : vector<32x72xf32>
    %57 = arith.truncf %56 : vector<32x72xf32> to vector<32x72xbf16>
    %c0_49 = arith.constant 0 : index
    %c0_50 = arith.constant 0 : index
    %58 = vector.load %arg5[%c0_49, %c0_50] : memref<32x72xbf16, #tpu.memory_space<vmem>>, vector<32x72xbf16>
    tpu.vector_store %arg5[%c0_49, %c0_50], %57 {strides = array<i32>} : memref<32x72xbf16, #tpu.memory_space<vmem>>, vector<32x72xbf16>,
    return
  }
  func.func @transform_0(%arg0: i32) -> (i32, i32) {
    %c0_i32 = arith.constant 0 : i32
    %c0_i32_0 = arith.constant 0 : i32
    %c0_i32_1 = arith.constant 0 : i32
    return %c0_i32, %c0_i32_0 : i32, i32
  }
  func.func @transform_1(%arg0: i32) -> (i32, i32, i32) {
    %c0_i32 = arith.constant 0 : i32
    %c0_i32_0 = arith.constant 0 : i32
    %c0_i32_1 = arith.constant 0 : i32
    %c0_i32_2 = arith.constant 0 : i32
    return %c0_i32, %c0_i32_0, %c0_i32_1 : i32, i32, i32
  }
  func.func @transform_2(%arg0: i32) -> (i32, i32) {
    %c0_i32 = arith.constant 0 : i32
    %c0_i32_0 = arith.constant 0 : i32
    %c0_i32_1 = arith.constant 0 : i32
    return %c0_i32, %c0_i32_0 : i32, i32
  }
  func.func @transform_3(%arg0: i32) -> (i32, i32) {
    %c0_i32 = arith.constant 0 : i32
    %c0_i32_0 = arith.constant 0 : i32
    %c0_i32_1 = arith.constant 0 : i32
    return %c0_i32, %c0_i32_0 : i32, i32
  }
  func.func @transform_4(%arg0: i32) -> (i32, i32) {
    %c0_i32 = arith.constant 0 : i32
    %c0_i32_0 = arith.constant 0 : i32
    %c0_i32_1 = arith.constant 0 : i32
    return %c0_i32, %c0_i32_0 : i32, i32
  }
}

module attributes {stable_mosaic.version = 11 : i64} {
  func.func @_mm_skip_kernel(%arg0: i32, %arg1: memref<128x32xbf16, #tpu.memory_space<vmem>>, %arg2: memref<64x128xbf16, #tpu.memory_space<vmem>>, %arg3: memref<64x1xf32, #tpu.memory_space<vmem>>, %arg4: memref<64x32xbf16, #tpu.memory_space<vmem>>, %arg5: memref<64x32xbf16, #tpu.memory_space<vmem>>) attributes {dimension_semantics = [#tpu.dimension_semantics<parallel>], iteration_bounds = array<i64: 1>, scalar_prefetch = 0 : i64, scratch_operands = 0 : i64, tpu.core_type = #tpu.core_type<tc>, window_params = [{transform_indices = @transform_0, window_bounds = array<i64: 128, 32>}, {pipeline_mode = #tpu.pipeline_mode<synchronous>, transform_indices = @transform_1, window_bounds = array<i64: 64, 128>}, {pipeline_mode = #tpu.pipeline_mode<synchronous>, transform_indices = @transform_2, window_bounds = array<i64: 64, 1>}, {transform_indices = @transform_3, window_bounds = array<i64: 64, 32>}, {transform_indices = @transform_4, window_bounds = array<i64: 64, 32>}]} {
    %c0 = arith.constant 0 : index
    %c0_0 = arith.constant 0 : index
    %0 = vector.load %arg2[%c0, %c0_0] : memref<64x128xbf16, #tpu.memory_space<vmem>>, vector<64x128xbf16>
    %c0_1 = arith.constant 0 : index
    %c0_2 = arith.constant 0 : index
    %1 = vector.load %arg1[%c0_1, %c0_2] : memref<128x32xbf16, #tpu.memory_space<vmem>>, vector<128x32xbf16>
    %cst = arith.constant dense<0.000000e+00> : vector<64x32xf32>
    %2 = tpu.matmul %0, %1, %cst {dimension_numbers = #tpu.dot_dimension_numbers<[1], [0], [0], [1], [0, 0, 1, 1], [], []>} : vector<64x128xbf16>, vector<128x32xbf16>, vector<64x32xf32> -> vector<64x32xf32>
    %c0_3 = arith.constant 0 : index
    %c0_4 = arith.constant 0 : index
    %3 = vector.load %arg3[%c0_3, %c0_4] : memref<64x1xf32, #tpu.memory_space<vmem>>, vector<64x1xf32>
    %4 = vector.broadcast %3 : vector<64x1xf32> to vector<64x32xf32>
    %5 = arith.addf %2, %4 : vector<64x32xf32>
    %c0_5 = arith.constant 0 : index
    %c0_6 = arith.constant 0 : index
    %6 = vector.load %arg4[%c0_5, %c0_6] : memref<64x32xbf16, #tpu.memory_space<vmem>>, vector<64x32xbf16>
    %7 = arith.extf %6 : vector<64x32xbf16> to vector<64x32xf32>
    %8 = arith.addf %5, %7 : vector<64x32xf32>
    %cst_7 = arith.constant 0.000000e+00 : f32
    %9 = vector.broadcast %cst_7 : f32 to vector<64x32xf32>
    %10 = arith.maximumf %8, %9 : vector<64x32xf32>
    %11 = arith.truncf %10 : vector<64x32xf32> to vector<64x32xbf16>
    %c0_8 = arith.constant 0 : index
    %c0_9 = arith.constant 0 : index
    %12 = vector.load %arg5[%c0_8, %c0_9] : memref<64x32xbf16, #tpu.memory_space<vmem>>, vector<64x32xbf16>
    tpu.vector_store %arg5[%c0_8, %c0_9], %11 {strides = array<i32>} : memref<64x32xbf16, #tpu.memory_space<vmem>>, vector<64x32xbf16>,
    return
  }
  func.func @transform_0(%arg0: i32) -> (i32, i32) {
    %c0_i32 = arith.constant 0 : i32
    %c0_i32_0 = arith.constant 0 : i32
    return %c0_i32, %arg0 : i32, i32
  }
  func.func @transform_1(%arg0: i32) -> (i32, i32) {
    %c0_i32 = arith.constant 0 : i32
    %c0_i32_0 = arith.constant 0 : i32
    %c0_i32_1 = arith.constant 0 : i32
    return %c0_i32, %c0_i32_0 : i32, i32
  }
  func.func @transform_2(%arg0: i32) -> (i32, i32) {
    %c0_i32 = arith.constant 0 : i32
    %c0_i32_0 = arith.constant 0 : i32
    %c0_i32_1 = arith.constant 0 : i32
    return %c0_i32, %c0_i32_0 : i32, i32
  }
  func.func @transform_3(%arg0: i32) -> (i32, i32) {
    %c0_i32 = arith.constant 0 : i32
    %c0_i32_0 = arith.constant 0 : i32
    return %c0_i32, %arg0 : i32, i32
  }
  func.func @transform_4(%arg0: i32) -> (i32, i32) {
    %c0_i32 = arith.constant 0 : i32
    %c0_i32_0 = arith.constant 0 : i32
    return %c0_i32, %arg0 : i32, i32
  }
}

module attributes {stable_mosaic.version = 11 : i64} {
  func.func @_mm_kernel(%arg0: i32, %arg1: memref<256x32xbf16, #tpu.memory_space<vmem>>, %arg2: memref<96x256xbf16, #tpu.memory_space<vmem>>, %arg3: memref<96x1xf32, #tpu.memory_space<vmem>>, %arg4: memref<96x32xf32, #tpu.memory_space<vmem>>) attributes {dimension_semantics = [#tpu.dimension_semantics<parallel>], iteration_bounds = array<i64: 1>, scalar_prefetch = 0 : i64, scratch_operands = 0 : i64, tpu.core_type = #tpu.core_type<tc>, window_params = [{transform_indices = @transform_0, window_bounds = array<i64: 256, 32>}, {pipeline_mode = #tpu.pipeline_mode<synchronous>, transform_indices = @transform_1, window_bounds = array<i64: 96, 256>}, {pipeline_mode = #tpu.pipeline_mode<synchronous>, transform_indices = @transform_2, window_bounds = array<i64: 96, 1>}, {transform_indices = @transform_3, window_bounds = array<i64: 96, 32>}]} {
    %c0 = arith.constant 0 : index
    %c0_0 = arith.constant 0 : index
    %0 = vector.load %arg2[%c0, %c0_0] : memref<96x256xbf16, #tpu.memory_space<vmem>>, vector<96x256xbf16>
    %c0_1 = arith.constant 0 : index
    %c0_2 = arith.constant 0 : index
    %1 = vector.load %arg1[%c0_1, %c0_2] : memref<256x32xbf16, #tpu.memory_space<vmem>>, vector<256x32xbf16>
    %cst = arith.constant dense<0.000000e+00> : vector<96x32xf32>
    %2 = tpu.matmul %0, %1, %cst {dimension_numbers = #tpu.dot_dimension_numbers<[1], [0], [0], [1], [0, 0, 1, 1], [], []>} : vector<96x256xbf16>, vector<256x32xbf16>, vector<96x32xf32> -> vector<96x32xf32>
    %c0_3 = arith.constant 0 : index
    %c0_4 = arith.constant 0 : index
    %3 = vector.load %arg3[%c0_3, %c0_4] : memref<96x1xf32, #tpu.memory_space<vmem>>, vector<96x1xf32>
    %4 = vector.broadcast %3 : vector<96x1xf32> to vector<96x32xf32>
    %5 = arith.addf %2, %4 : vector<96x32xf32>
    %c0_5 = arith.constant 0 : index
    %c0_6 = arith.constant 0 : index
    %6 = vector.load %arg4[%c0_5, %c0_6] : memref<96x32xf32, #tpu.memory_space<vmem>>, vector<96x32xf32>
    tpu.vector_store %arg4[%c0_5, %c0_6], %5 {strides = array<i32>} : memref<96x32xf32, #tpu.memory_space<vmem>>, vector<96x32xf32>,
    return
  }
  func.func @transform_0(%arg0: i32) -> (i32, i32) {
    %c0_i32 = arith.constant 0 : i32
    %c0_i32_0 = arith.constant 0 : i32
    return %c0_i32, %arg0 : i32, i32
  }
  func.func @transform_1(%arg0: i32) -> (i32, i32) {
    %c0_i32 = arith.constant 0 : i32
    %c0_i32_0 = arith.constant 0 : i32
    %c0_i32_1 = arith.constant 0 : i32
    return %c0_i32, %c0_i32_0 : i32, i32
  }
  func.func @transform_2(%arg0: i32) -> (i32, i32) {
    %c0_i32 = arith.constant 0 : i32
    %c0_i32_0 = arith.constant 0 : i32
    %c0_i32_1 = arith.constant 0 : i32
    return %c0_i32, %c0_i32_0 : i32, i32
  }
  func.func @transform_3(%arg0: i32) -> (i32, i32) {
    %c0_i32 = arith.constant 0 : i32
    %c0_i32_0 = arith.constant 0 : i32
    return %c0_i32, %arg0 : i32, i32
  }
}

</mosaic_0001>

<bundles_post_ra>
// kernel: fcn_forward.5
= control target key start
LH: loop header
LB: loop body
LE: loop exit
PB: predicated region body
PF: predicated region fallthrough
CT: control target
= control target key end

     0   :  { %vm53_vm0 = vcmask 1044480   ;;  %vm54_vm1 = vcmask 1045504   ;;  %v149_v0 = vmov 0.0   ;;  %v150_v2 = vmov 65535   ;;  %s191_s0 = inlined_call_operand.vmem [shape: bf16[27,128], index: 0, kind: input, shape index: {}]   ;;  %s192_s2 = inlined_call_operand.vmem [shape: f32[16,1], index: 2, kind: input, shape index: {}]   ;;  %s193_s1 = inlined_call_operand.vmem [shape: bf16[16,27], index: 1, kind: input, shape index: {}]   ;;  %s194_s3 = inlined_call_operand.vmem [shape: bf16[16,128], index: 3, kind: output, shape index: {}]  }
   0x1   :  { %133 = vmatprep.subr.bf16.mxu0 %v149_v0  ;;  %v146_v1 = vld [vmem:[%s191_s0] sm:$0xff]   ;;  %v55_v3 = vsel %vm53_vm0, 4294967295, %v150_v2  ;;  %v147_v4 = vld [vmem:[%s191_s0 + $0x8] sm:$0x3f]   ;;  %vm151_vm2 = vmmov 0   ;;  %v152_v8 = vmov 0  }
   0x2   :  { %134 = vmatpush3.bf16.msra.mxu0 %v146_v1  ;;  %v56_v5 = vsel %vm54_vm1, %v55_v3, 0  ;;  %137 = vmatprep.mubr.msk.bf16.mxu0 %vm151_vm2, %v149_v0  ;;  %v21_v7 = vld [vmem:[%s192_s2] sm:$0xff]  ;;  %vm49_vm3 = vcmask 220160   ;;  %v22_v10 = vld [vmem:[%s192_s2 + $0x8] sm:$0xff] }
   0x3   :  { %135 = vmatprep.subr.bf16.mxu0 %v149_v0  ;;  %v58_v6 = vand.u32 %v147_v4, %v56_v5  ;;  %145 = vset.pattern.permute.xlu0 %v152_v8  ;;  %v148_v9 = vld [vmem:[%s193_s1] sm:$0xff]  }
   0x4   :  { %25 = vperm.xlu0 %145, %v21_v7  }
   0x6   :  { %136 = vmatpush3.bf16.msra.mxu0 %v58_v6 }
   0x8   :  { %30 = vperm.xlu0 %145, %v22_v10  }
   0x9   :  { %138 = vmatmul.mubr.msk.bf16.vlgmr.msra.gmra.mrb[0].mxu0 %vm49_vm3, %v148_v9 }
  0x83   :  { %v26_v11 = vpop.permute.xlu0 %25 }
  0x87   :  { %v31_v15 = vpop.permute.xlu0 %30 }
  0xdc   :  { %v94_v12 = vpop.f32.mrb[0].mxu0 }
  0xdd   :  { %v95_v13 = vadd.f32 %v94_v12, %v26_v11  ;;  %v139_v14 = vpop.f32.mrb[1].mxu0 }
  0xde   :  { %v97_v16 = vpop.f32.mrb[2].mxu0 }
  0xdf   :  { %v98_v17 = vadd.f32 %v97_v16, %v31_v15  ;;  %v140_v18 = vpop.f32.mrb[3].mxu0  ;;  %v101_v19 = vmax.f32 %v95_v13, 0.0 }
  0xe1   :  { %v102_v20 = vmax.f32 %v98_v17, 0.0 }
  0xe3   :  { %v128_v21 = vpack.c.bf16 %v102_v20, %v101_v19 }
  0xe5   :  { %129 = vst [vmem:[%s194_s3] sm:$0xff] %v128_v21  }

// kernel: tile.15
= control target key start
LH: loop header
LB: loop body
LE: loop exit
PB: predicated region body
PF: predicated region fallthrough
CT: control target
= control target key end

     0   :  { %s51_s10 = smov 30   ;;  %s52_s11 = smov 18   ;;  %vm3_vm0 = vcmask 48128   ;;  %vm9_vm1 = vcmask 294128   ;;  %vm15_vm2 = vcmask 244928   ;;  %vm21_vm3 = vcmask 195728   ;;  %s87_s0 = inlined_call_operand.vmem [shape: f32[6,6], index: 0, kind: input, shape index: {}]   ;;  %s88_s1 = inlined_call_operand.vmem [shape: f32[36], index: 1, kind: output, shape index: {}]  }
   0x1   :  { %v41_v0 = vld [vmem:[%s87_s0 + $0x5] sm:$0x1]   ;;  %v43_v1 = vld [vmem:[%s87_s0 + $0x3] sm:$0x1]   ;;  %v42_v2 = vld [vmem:[%s87_s0 + $0x4] sm:$0x1]  }
   0x2   :  { %7 = vrot.lane.b32.xlu0 %v41_v0, %s51_s10  ;;  %19 = vrot.lane.b32.xlu1 %v43_v1, %s52_s11  ;;  %v44_v3 = vld [vmem:[%s87_s0 + $0x2] sm:$0x1]   ;;  %v2_v4 = vld [vmem:[%s87_s0] sm:$0x1]   ;;  %s53_s18 = smov 24   ;;  %s54_s19 = smov 12  }
   0x3   :  { %4 = vst.msk [vmem:[#allocation0] sm:$0x1] %vm3_vm0, %v2_v4   ;;  %v45_v5 = vld [vmem:[%s87_s0 + $0x1] sm:$0x1]   ;;  %s55_s0 = smov 6   ;;  %vm27_vm4 = vcmask 146528  }
   0x4   :  { %vm33_vm5 = vcmask 97328  }
   0x6   :  { %13 = vrot.lane.b32.xlu0 %v42_v2, %s53_s18  ;;  %25 = vrot.lane.b32.xlu1 %v44_v3, %s54_s19 }
   0xa   :  { %31 = vrot.lane.b32.xlu0 %v45_v5, %s55_s0 }
  0x74   :  { %v8_v6 = vpop.permute.xlu0 %7   ;;  %v20_v7 = vpop.permute.xlu1 %19  }
  0x75   :  { %10 = vst.msk [vmem:[#allocation0] sm:$0x1] %vm9_vm1, %v8_v6  }
  0x78   :  { %v14_v8 = vpop.permute.xlu0 %13   ;;  %v26_v9 = vpop.permute.xlu1 %25  }
  0x79   :  { %16 = vst.msk [vmem:[#allocation0] sm:$0x1] %vm15_vm2, %v14_v8  }
  0x7a   :  { %22 = vst.msk [vmem:[#allocation0] sm:$0x1] %vm21_vm3, %v20_v7  }
  0x7b   :  { %28 = vst.msk [vmem:[#allocation0] sm:$0x1] %vm27_vm4, %v26_v9  }
  0x7c   :  { %v32_v10 = vpop.permute.xlu0 %31  }
  0x7d   :  { %34 = vst.msk [vmem:[#allocation0] sm:$0x1] %vm33_vm5, %v32_v10  }
  0x84   :  { %v38_v11 = vld [vmem:[#allocation0] sm:$0x1] }
  0x85   :  { %40 = vst [vmem:[%s88_s1] sm:$0x1] %v38_v11 }

// kernel: tile.16
= control target key start
LH: loop header
LB: loop body
LE: loop exit
PB: predicated region body
PF: predicated region fallthrough
CT: control target
= control target key end

     0   :  { %s22_s0 = inlined_call_operand.vmem [shape: f32[36], index: 0, kind: input, shape index: {}]   ;;  %s23_s1 = inlined_call_operand.vmem [shape: f32[2,36], index: 1, kind: output, shape index: {}]  }
   0x1   :  { %v4_v0 = vld [vmem:[%s22_s0] ss:$0 sm:$0xff] }
   0x2   :  { %5 = vst [vmem:[%s23_s1] sm:$0x3] %v4_v0 }

// kernel: tile.17
= control target key start
LH: loop header
LB: loop body
LE: loop exit
PB: predicated region body
PF: predicated region fallthrough
CT: control target
= control target key end

     0   :  { %vm7_vm0 = vcmask 293888   ;;  %vm13_vm1 = vcmask 589088   ;;  %s39_s0 = inlined_call_operand.vmem [shape: f32[2,36], index: 0, kind: input, shape index: {}]   ;;  %s40_s1 = inlined_call_operand.vmem [shape: f32[1,72], index: 1, kind: output, shape index: {}]  }
   0x1   :  { %v4_v0 = vld [vmem:[%s39_s0] sm:$0x3]  ;;  %s22_s0 = smov 36  }
   0x2   :  { %5 = vst [vmem:[#allocation1] sm:$0x3] %v4_v0 }
   0x9   :  { %v10_v1 = vld [vmem:[#allocation1 + $0x1] sm:$0x1]   ;;  %v6_v2 = vld [vmem:[#allocation1] sm:$0x1]  }
   0xa   :  { %11 = vrot.lane.b32.xlu0 %v10_v1, %s22_s0  ;;  %8 = vst.msk [vmem:[#allocation0] sm:$0x1] %vm7_vm0, %v6_v2  }
  0x7c   :  { %v12_v3 = vpop.permute.xlu0 %11  }
  0x7d   :  { %14 = vst.msk [vmem:[#allocation0] sm:$0x1] %vm13_vm1, %v12_v3  }
  0x84   :  { %v18_v4 = vld [vmem:[#allocation0] sm:$0x1] }
  0x85   :  { %20 = vst [vmem:[%s40_s1] sm:$0x1] %v18_v4 }

// kernel: fcn_forward.6
= control target key start
LH: loop header
LB: loop body
LE: loop exit
PB: predicated region body
PF: predicated region fallthrough
CT: control target
= control target key end

     0   :  { %v277_v0 = vmov 0   ;;  %vm133_vm0 = vcmask 130048   ;;  %vm209_vm1 = vcmask 257024   ;;  %s361_s0 = inlined_call_operand.vmem [shape: bf16[144,32], index: 0, kind: input, shape index: {}]   ;;  %s362_s1 = inlined_call_operand.vmem [shape: bf16[32,144], index: 1, kind: input, shape index: {}]   ;;  %s363_s2 = inlined_call_operand.vmem [shape: f32[32,1], index: 2, kind: input, shape index: {}]   ;;  %s364_s3 = inlined_call_operand.vmem [shape: bf16[32,32], index: 3, kind: output, shape index: {}]  }
   0x1   :  { %140 = vmatprep.subr.bf16.mxu0 %v277_v0  ;;  %241 = vmatprep.subr.bf16.mxu1 %v277_v0  ;;  %v262_v1 = vld [vmem:[%s361_s0] sm:$0xff]   ;;  %v263_v2 = vld [vmem:[%s361_s0 + $0x8] sm:$0xff]   ;;  %v264_v3 = vld [vmem:[%s361_s0 + $0x10] sm:$0xff]  }
   0x2   :  { %261 = vset.pattern.permute.xlu1 %v277_v0  ;;  %260 = vset.pattern.permute.xlu0 %v277_v0  ;;  %v265_v4 = vld [vmem:[%s361_s0 + $0x18] sm:$0xff]   ;;  %v273_v5 = vld [vmem:[%s362_s1 + $0x4] ss:$8 sps:$4 sm:$0xff]   ;;  %v39_v7 = vld [vmem:[%s363_s2 + $0x10] sm:$0xff] }
   0x3   :  { %141 = vmatpush1.bf16.msra.mxu0 %v262_v1  ;;  %250 = vmatpush1.bf16.msra.mxu1 %v262_v1  ;;  %v276_v6 = vld [vmem:[%s362_s1 + $0x14] ss:$8 sps:$4 sm:$0xff]   ;;  %v37_v8 = vld [vmem:[%s363_s2] sm:$0xff]  ;;  %v38_v11 = vld [vmem:[%s363_s2 + $0x8] sm:$0xff] }
   0x4   :  { %142 = vmatprep.subr.bf16.mxu0 %v277_v0  ;;  %242 = vmatprep.subr.bf16.mxu1 %v277_v0  ;;  %v40_v9 = vld [vmem:[%s363_s2 + $0x18] sm:$0xff]  ;;  %v266_v10 = vld [vmem:[%s361_s0 + $0x20] sm:$0xff]   ;;  %v267_v12 = vld [vmem:[%s361_s0 + $0x28] sm:$0xff]  }
   0x5   :  { %231 = vmatprep.mubr.msk.bf16.mxu0 %vm133_vm0, %v273_v5  ;;  %53 = vperm.xlu1 %261, %v39_v7   ;;  %v268_v13 = vld [vmem:[%s361_s0 + $0x30] sm:$0xff]   ;;  %v269_v14 = vld [vmem:[%s361_s0 + $0x38] sm:$0xff]   ;;  %v270_v15 = vld [vmem:[%s361_s0 + $0x40] sm:$0xff]  }
   0x6   :  { %232 = vmatprep.mubr.msk.bf16.mxu1 %vm133_vm0, %v276_v6  ;;  %43 = vperm.xlu0 %260, %v37_v8   ;;  %v271_v16 = vld [vmem:[%s362_s1] ss:$8 sps:$4 sm:$0xff]   ;;  %v274_v17 = vld [vmem:[%s362_s1 + $0x10] ss:$8 sps:$4 sm:$0xff]  }
   0x7   :  { %143 = vmatpush1.bf16.msra.mxu0 %v263_v2  ;;  %251 = vmatpush1.bf16.msra.mxu1 %v263_v2 }
   0x8   :  { %144 = vmatprep.subr.bf16.mxu0 %v277_v0  ;;  %243 = vmatprep.subr.bf16.mxu1 %v277_v0 }
   0x9   :  { %58 = vperm.xlu1 %261, %v40_v9  }
   0xa   :  { %48 = vperm.xlu0 %260, %v38_v11  }
   0xb   :  { %145 = vmatpush1.bf16.msra.mxu0 %v264_v3  ;;  %252 = vmatpush1.bf16.msra.mxu1 %v264_v3 }
   0xc   :  { %146 = vmatprep.subr.bf16.mxu0 %v277_v0  ;;  %244 = vmatprep.subr.bf16.mxu1 %v277_v0 }
   0xf   :  { %147 = vmatpush1.bf16.msra.mxu0 %v265_v4  ;;  %253 = vmatpush1.bf16.msra.mxu1 %v265_v4 }
  0x10   :  { %148 = vmatprep.subr.bf16.mxu0 %v277_v0  ;;  %245 = vmatprep.subr.bf16.mxu1 %v277_v0 }
  0x13   :  { %149 = vmatpush1.bf16.msra.mxu0 %v266_v10  ;;  %254 = vmatpush1.bf16.msra.mxu1 %v266_v10 }
  0x14   :  { %150 = vmatprep.subr.bf16.mxu0 %v277_v0  ;;  %246 = vmatprep.subr.bf16.mxu1 %v277_v0 }
  0x17   :  { %151 = vmatpush1.bf16.msra.mxu0 %v267_v12  ;;  %255 = vmatpush1.bf16.msra.mxu1 %v267_v12 }
  0x18   :  { %152 = vmatprep.subr.bf16.mxu0 %v277_v0  ;;  %247 = vmatprep.subr.bf16.mxu1 %v277_v0 }
  0x1b   :  { %153 = vmatpush1.bf16.msra.mxu0 %v268_v13  ;;  %256 = vmatpush1.bf16.msra.mxu1 %v268_v13 }
  0x1c   :  { %154 = vmatprep.subr.bf16.mxu0 %v277_v0  ;;  %248 = vmatprep.subr.bf16.mxu1 %v277_v0 }
  0x1f   :  { %155 = vmatpush1.bf16.msra.mxu0 %v269_v14  ;;  %257 = vmatpush1.bf16.msra.mxu1 %v269_v14 }
  0x20   :  { %156 = vmatprep.subr.bf16.mxu0 %v277_v0  ;;  %249 = vmatprep.subr.bf16.mxu1 %v277_v0 }
  0x23   :  { %157 = vmatpush1.bf16.msra.mxu0 %v270_v15  ;;  %258 = vmatpush1.bf16.msra.mxu1 %v270_v15 }
  0x26   :  { %173 = vmatmul.mubr.bf16.vlgmr.msra.gmra.mrb[0].mxu0 %v271_v16  ;;  %181 = vmatmul.mubr.bf16.vlgmr.msra.gmra.mrb[0].mxu1 %v274_v17 }
  0x84   :  { %v54_v18 = vpop.permute.xlu1 %53 }
  0x85   :  { %v44_v19 = vpop.permute.xlu0 %43 }
  0x88   :  { %v59_v20 = vpop.permute.xlu1 %58 }
  0x89   :  { %v49_v21 = vpop.permute.xlu0 %48 }
  0xf9   :  { %v174_v22 = vpop.f32.mrb[0].mxu0  ;;  %v182_v23 = vpop.f32.mrb[0].mxu1 }
  0xfa   :  { %v175_v24 = vadd.f32 %v174_v22, %v44_v19  ;;  %v183_v25 = vadd.f32 %v182_v23, %v54_v18  ;;  %v176_v26 = vpop.f32.mrb[1].mxu0  ;;  %v184_v27 = vpop.f32.mrb[1].mxu1 }
  0xfb   :  { %v177_v28 = vpop.f32.mrb[2].mxu0  ;;  %v185_v29 = vpop.f32.mrb[2].mxu1 }
  0xfc   :  { %v189_v30 = vmax.f32 %v175_v24, 0.0  ;;  %v191_v31 = vmax.f32 %v183_v25, 0.0  ;;  %v178_v32 = vadd.f32 %v177_v28, %v49_v21  ;;  %v186_v33 = vadd.f32 %v185_v29, %v59_v20  ;;  %v179_v34 = vpop.f32.mrb[3].mxu0  ;;  %v187_v35 = vpop.f32.mrb[3].mxu1 }
  0xfe   :  { %v237_v36 = vpack.c.bf16 %v189_v30, %v189_v30  ;;  %v239_v37 = vpack.c.bf16 %v191_v31, %v191_v31  ;;  %v190_v38 = vmax.f32 %v178_v32, 0.0  ;;  %v192_v39 = vmax.f32 %v186_v33, 0.0 }
 0x100   :  { %210 = vst.msk [vmem:[%s364_s3] sm:$0xf] %vm209_vm1, %v237_v36  ;;  %212 = vst.msk [vmem:[%s364_s3 + $0x8] sm:$0xf] %vm209_vm1, %v239_v37  ;;  %v238_v40 = vpack.c.bf16 %v190_v38, %v190_v38  ;;  %v240_v41 = vpack.c.bf16 %v192_v39, %v192_v39 }
 0x102   :  { %211 = vst.msk [vmem:[%s364_s3 + $0x4] sm:$0xf] %vm209_vm1, %v238_v40  ;;  %213 = vst.msk [vmem:[%s364_s3 + $0xc] sm:$0xf] %vm209_vm1, %v240_v41 }

// kernel: fcn_forward.7
= control target key start
LH: loop header
LB: loop body
LE: loop exit
PB: predicated region body
PF: predicated region fallthrough
CT: control target
= control target key end

     0   :  { %vm57_vm0 = vcmask 261120   ;;  %s1098_s21 = smov 121   ;;  %s1099_s22 = smov 127   ;;  %v1106_v4 = vmov 0   ;;  %vm823_vm1 = vcmask 584704   ;;  %s1269_s0 = inlined_call_operand.vmem [shape: bf16[32,86], index: 0, kind: input, shape index: {}]   ;;  %s1270_s1 = inlined_call_operand.vmem [shape: bf16[9,32,32], index: 1, kind: input, shape index: {}]   ;;  %s1271_s2 = inlined_call_operand.vmem [shape: f32[32,1], index: 2, kind: input, shape index: {}]   ;;  %s1272_s3 = inlined_call_operand.vmem [shape: f32[1,72], index: 3, kind: input, shape index: {}]   ;;  %s1273_s4 = inlined_call_operand.vmem [shape: bf16[32,72], index: 4, kind: output, shape index: {}]  }
   0x1   :  { %v1135_v0 = vld [vmem:[%s1269_s0] sm:$0xff]   ;;  %v1140_v1 = vld [vmem:[%s1269_s0 + $0x8] sm:$0xff]   ;;  %v1076_v3 = vld [vmem:[%s1270_s1 + $0x10] sm:$0xff]   ;;  %s1100_s0 = smov 120   ;;  %s1101_s25 = smov 116   ;;  %1061 = vset.pattern.permute.xlu1 %v1106_v4  ;;  %1060 = vset.pattern.permute.xlu0 %v1106_v4 }
   0x2   :  { %v1074_v2 = vld [vmem:[%s1270_s1 + $0x40] sm:$0xff]   ;;  %355 = vrot.lane.b32.xlu0 %v1135_v0, %s1098_s21  ;;  %51 = vrot.lane.b32.xlu1 %v1135_v0, %s1099_s22  ;;  %s1102_s26 = smov 126   ;;  %s1103_s27 = smov 115   ;;  %v745_v5 = vld [vmem:[%s1271_s2 + $0x8] sm:$0xff]  ;;  %v742_v7 = vunpack.c.l.bf16 %v1140_v1  ;;  %v743_v8 = vunpack.c.h.bf16 %v1140_v1  ;;  %v740_v9 = vunpack.c.l.bf16 %v1135_v0  ;;  %v741_v10 = vunpack.c.h.bf16 %v1135_v0 }
   0x3   :  { %983 = vmatprep.mubr.msk.bf16.mxu0 %vm57_vm0, %v1074_v2  ;;  %951 = vmatprep.mubr.msk.bf16.mxu1 %vm57_vm0, %v1076_v3  ;;  %s1104_s28 = smov 122   ;;  %s1105_s29 = smov 114   ;;  %v744_v6 = vld [vmem:[%s1271_s2] sm:$0xff]  ;;  %v746_v11 = vld [vmem:[%s1271_s2 + $0x10] sm:$0xff]  ;;  %v747_v12 = vld [vmem:[%s1271_s2 + $0x18] sm:$0xff] }
   0x4   :  { %v1067_v13 = vpack.i.bf16 %v743_v8, %v742_v7  ;;  %v1062_v14 = vpack.i.bf16 %v741_v10, %v740_v9  ;;  %v1075_v19 = vld [vmem:[%s1270_s1 + $0x48] sm:$0xff]   ;;  %v1078_v22 = vld [vmem:[%s1270_s1 + $0x50] sm:$0xff]   ;;  %v1077_v23 = vld [vmem:[%s1270_s1 + $0x18] sm:$0xff]  }
   0x5   :  { %v1080_v25 = vld [vmem:[%s1270_s1] sm:$0xff]   ;;  %v1079_v27 = vld [vmem:[%s1270_s1 + $0x58] sm:$0xff]   ;;  %v1081_v30 = vld [vmem:[%s1270_s1 + $0x8] sm:$0xff]  }
   0x6   :  { %357 = vrot.lane.b32.xlu0 %v1140_v1, %s1098_s21  ;;  %435 = vrot.lane.b32.xlu1 %v1135_v0, %s1100_s0  ;;  %v1082_v28 = vld [vmem:[%s1270_s1 + $0x60] sm:$0xff]   ;;  %v1083_v35 = vld [vmem:[%s1270_s1 + $0x68] sm:$0xff]  }
   0x7   :  { %v1084_v33 = vld [vmem:[%s1270_s1 + $0x20] sm:$0xff]   ;;  %v1086_v36 = vld [vmem:[%s1270_s1 + $0x70] sm:$0xff]   ;;  %v1085_v38 = vld [vmem:[%s1270_s1 + $0x28] sm:$0xff]  }
   0x8   :  { %v1088_v41 = vld [vmem:[%s1270_s1 + $0x30] sm:$0xff]   ;;  %v1087_v42 = vld [vmem:[%s1270_s1 + $0x78] sm:$0xff]   ;;  %v1090_v43 = vld [vmem:[%s1270_s1 + $0x80] sm:$0xff]  }
   0x9   :  { %v1089_v45 = vld [vmem:[%s1270_s1 + $0x38] sm:$0xff]   ;;  %v1091_v46 = vld [vmem:[%s1270_s1 + $0x88] sm:$0xff]  }
   0xa   :  { %53 = vrot.lane.b32.xlu0 %v1140_v1, %s1099_s22  ;;  %437 = vrot.lane.b32.xlu1 %v1140_v1, %s1100_s0 }
   0xe   :  { %515 = vrot.lane.b32.xlu0 %v1135_v0, %s1101_s25  ;;  %517 = vrot.lane.b32.xlu1 %v1140_v1, %s1101_s25 }
  0x12   :  { %195 = vrot.lane.b32.xlu0 %v1135_v0, %s1102_s26  ;;  %595 = vrot.lane.b32.xlu1 %v1135_v0, %s1103_s27 }
  0x16   :  { %197 = vrot.lane.b32.xlu0 %v1140_v1, %s1102_s26  ;;  %597 = vrot.lane.b32.xlu1 %v1140_v1, %s1103_s27 }
  0x1a   :  { %275 = vrot.lane.b32.xlu0 %v1135_v0, %s1104_s28  ;;  %675 = vrot.lane.b32.xlu1 %v1135_v0, %s1105_s29 }
  0x1e   :  { %277 = vrot.lane.b32.xlu0 %v1140_v1, %s1104_s28  ;;  %677 = vrot.lane.b32.xlu1 %v1140_v1, %s1105_s29 }
  0x22   :  { %755 = vperm.xlu1 %1061, %v745_v5   ;;  %750 = vperm.xlu0 %1060, %v744_v6   ;;  %v902_v5 = vld [vmem:[%s1272_s3] ss:$0 sm:$0xff] }
  0x26   :  { %760 = vperm.xlu1 %1061, %v746_v11   ;;  %765 = vperm.xlu0 %1060, %v747_v12  }
  0x2a   :  { %1068 = vrot.lane.b32.xlu0 %v1067_v13, %s1098_s21  ;;  %1063 = vrot.lane.b32.xlu1 %v1062_v14, %s1098_s21 }
  0x74   :  { %v356_v15 = vpop.permute.xlu0 %355  ;;  %v52_v16 = vpop.permute.xlu1 %51 }
  0x75   :  { %979 = vmatprep.subr.bf16.mxu0 %v356_v15  ;;  %947 = vmatprep.subr.bf16.mxu1 %v52_v16 }
  0x76   :  { %980 = vmatpush3.bf16.msra.mxu0 %v356_v15  ;;  %948 = vmatpush3.bf16.msra.mxu1 %v52_v16 }
  0x78   :  { %v358_v17 = vpop.permute.xlu0 %357  ;;  %v436_v18 = vpop.permute.xlu1 %435 }
  0x79   :  { %981 = vmatprep.subr.bf16.mxu0 %v358_v17 }
  0x7a   :  { %982 = vmatpush3.bf16.msra.mxu0 %v358_v17 }
  0x7b   :  { %987 = vmatprep.subr.bf16.mxu0 %v436_v18 }
  0x7c   :  { %v54_v20 = vpop.permute.xlu0 %53  ;;  %v438_v21 = vpop.permute.xlu1 %437 }
  0x7d   :  { %949 = vmatprep.subr.bf16.mxu1 %v54_v20  ;;  %984 = vmatmul.mubr.msk.bf16.vlgmr.msra.gmra.mrb[0].mxu0 %vm57_vm0, %v1075_v19 }
  0x7e   :  { %950 = vmatpush3.bf16.msra.mxu1 %v54_v20  ;;  %988 = vmatpush3.bf16.msra.mxu0 %v436_v18 }
  0x7f   :  { %989 = vmatprep.subr.bf16.mxu0 %v438_v21  ;;  %955 = vmatprep.subr.bf16.mxu1 %v1135_v0 }
  0x80   :  { %v516_v24 = vpop.permute.xlu0 %515  ;;  %991 = vmatprep.mubr.msk.bf16.mxu0 %vm57_vm0, %v1078_v22  ;;  %v518_v29 = vpop.permute.xlu1 %517 }
  0x81   :  { %952 = vmatmul.mubr.msk.bf16.vlgmr.msra.gmra.mrb[0].mxu1 %vm57_vm0, %v1077_v23 }
  0x82   :  { %990 = vmatpush3.bf16.msra.mxu0 %v438_v21  ;;  %956 = vmatpush3.bf16.msra.mxu1 %v1135_v0 }
  0x83   :  { %995 = vmatprep.subr.bf16.mxu0 %v516_v24  ;;  %957 = vmatprep.subr.bf16.mxu1 %v1140_v1 }
  0x84   :  { %959 = vmatprep.mubr.msk.bf16.mxu1 %vm57_vm0, %v1080_v25  ;;  %v196_v26 = vpop.permute.xlu0 %195  ;;  %v596_v31 = vpop.permute.xlu1 %595 }
  0x86   :  { %958 = vmatpush3.bf16.msra.mxu1 %v1140_v1 }
  0x87   :  { %963 = vmatprep.subr.bf16.mxu1 %v196_v26 }
  0x88   :  { %v198_v32 = vpop.permute.xlu0 %197  ;;  %v598_v37 = vpop.permute.xlu1 %597 }
  0x89   :  { %992 = vmatmul.mubr.msk.bf16.vlgmr.msra.gmra.mrb[0].mxu0 %vm57_vm0, %v1079_v27 }
  0x8a   :  { %996 = vmatpush3.bf16.msra.mxu0 %v516_v24  ;;  %999 = vmatprep.mubr.msk.bf16.mxu0 %vm57_vm0, %v1082_v28 }
  0x8b   :  { %997 = vmatprep.subr.bf16.mxu0 %v518_v29 }
  0x8c   :  { %v276_v34 = vpop.permute.xlu0 %275  ;;  %v676_v39 = vpop.permute.xlu1 %675 }
  0x8d   :  { %960 = vmatmul.mubr.msk.bf16.vlgmr.msra.gmra.mrb[0].mxu1 %vm57_vm0, %v1081_v30 }
  0x8e   :  { %998 = vmatpush3.bf16.msra.mxu0 %v518_v29  ;;  %964 = vmatpush3.bf16.msra.mxu1 %v196_v26 }
  0x8f   :  { %1003 = vmatprep.subr.bf16.mxu0 %v596_v31  ;;  %965 = vmatprep.subr.bf16.mxu1 %v198_v32 }
  0x90   :  { %967 = vmatprep.mubr.msk.bf16.mxu1 %vm57_vm0, %v1084_v33  ;;  %v278_v40 = vpop.permute.xlu0 %277  ;;  %v678_v44 = vpop.permute.xlu1 %677 }
  0x92   :  { %966 = vmatpush3.bf16.msra.mxu1 %v198_v32 }
  0x93   :  { %971 = vmatprep.subr.bf16.mxu1 %v276_v34 }
  0x95   :  { %1000 = vmatmul.mubr.msk.bf16.vlgmr.msra.gmra.mrb[0].mxu0 %vm57_vm0, %v1083_v35 }
  0x96   :  { %1004 = vmatpush3.bf16.msra.mxu0 %v596_v31  ;;  %1007 = vmatprep.mubr.msk.bf16.mxu0 %vm57_vm0, %v1086_v36 }
  0x97   :  { %1005 = vmatprep.subr.bf16.mxu0 %v598_v37 }
  0x99   :  { %968 = vmatmul.mubr.msk.bf16.vlgmr.msra.gmra.mrb[0].mxu1 %vm57_vm0, %v1085_v38 }
  0x9a   :  { %1006 = vmatpush3.bf16.msra.mxu0 %v598_v37  ;;  %972 = vmatpush3.bf16.msra.mxu1 %v276_v34 }
  0x9b   :  { %1011 = vmatprep.subr.bf16.mxu0 %v676_v39  ;;  %973 = vmatprep.subr.bf16.mxu1 %v278_v40 }
  0x9c   :  { %975 = vmatprep.mubr.msk.bf16.mxu1 %vm57_vm0, %v1088_v41 }
  0x9e   :  { %974 = vmatpush3.bf16.msra.mxu1 %v278_v40 }
  0xa1   :  { %1008 = vmatmul.mubr.msk.bf16.vlgmr.msra.gmra.mrb[0].mxu0 %vm57_vm0, %v1087_v42  ;;  %v751_v47 = vpop.permute.xlu0 %750  ;;  %v756_v48 = vpop.permute.xlu1 %755 }
  0xa2   :  { %1012 = vmatpush3.bf16.msra.mxu0 %v676_v39  ;;  %1015 = vmatprep.mubr.msk.bf16.mxu0 %vm57_vm0, %v1090_v43 }
  0xa3   :  { %1013 = vmatprep.subr.bf16.mxu0 %v678_v44 }
  0xa5   :  { %976 = vmatmul.mubr.msk.bf16.vlgmr.msra.gmra.mrb[0].mxu1 %vm57_vm0, %v1089_v45  ;;  %v766_v50 = vpop.permute.xlu0 %765  ;;  %v761_v54 = vpop.permute.xlu1 %760 }
  0xa6   :  { %1014 = vmatpush3.bf16.msra.mxu0 %v678_v44 }
  0xa9   :  { %v1069_v55 = vpop.permute.xlu0 %1068  ;;  %v1064_v56 = vpop.permute.xlu1 %1063 }
  0xad   :  { %1016 = vmatmul.mubr.msk.bf16.vlgmr.msra.gmra.mrb[0].mxu0 %vm57_vm0, %v1091_v46 }
 0x178   :  { %v977_v49 = vpop.f32.mrb[0].mxu1 }
 0x179   :  { %v321_v51 = vpop.f32.mrb[1].mxu1 }
 0x17a   :  { %v978_v52 = vpop.f32.mrb[2].mxu1 }
 0x17b   :  { %v324_v53 = vpop.f32.mrb[3].mxu1 }
 0x180   :  { %v1017_v57 = vpop.f32.mrb[0].mxu0 }
 0x181   :  { %v1019_v58 = vadd.f32 %v1017_v57, %v977_v49  ;;  %v721_v59 = vpop.f32.mrb[1].mxu0 }
 0x182   :  { %v1020_v60 = vadd.f32 %v721_v59, %v321_v51  ;;  %v1018_v61 = vpop.f32.mrb[2].mxu0 }
 0x183   :  { %v770_v62 = vadd.f32 %v1019_v58, %v761_v54  ;;  %v1021_v63 = vadd.f32 %v1018_v61, %v978_v52  ;;  %v724_v0 = vpop.f32.mrb[3].mxu0 }
 0x184   :  { %v768_v1 = vadd.f32 %v1020_v60, %v751_v47  ;;  %v1022_v2 = vadd.f32 %v724_v0, %v324_v53 }
 0x185   :  { %v771_v3 = vadd.f32 %v1021_v63, %v766_v50  ;;  %v1094_v4 = vadd.low.f32.bf16 %v770_v62, %v1069_v55 }
 0x186   :  { %v1095_v6 = vadd.low.f32.bf16 %v768_v1, %v1064_v56  ;;  %v769_v7 = vadd.f32 %v1022_v2, %v756_v48 }
 0x187   :  { %v1096_v8 = vadd.high.f32.bf16 %v771_v3, %v1069_v55  ;;  %v794_v9 = vmax.f32 %v1094_v4, 0.0 }
 0x188   :  { %v792_v10 = vmax.f32 %v1095_v6, 0.0  ;;  %v1097_v11 = vadd.high.f32.bf16 %v769_v7, %v1064_v56 }
 0x189   :  { %v795_v12 = vmax.f32 %v1096_v8, 0.0  ;;  %v805_v13 = vmul.f32 %v902_v5, %v794_v9 }
 0x18a   :  { %v803_v14 = vmul.f32 %v902_v5, %v792_v10  ;;  %v793_v15 = vmax.f32 %v1097_v11, 0.0 }
 0x18b   :  { %v806_v16 = vmul.f32 %v902_v5, %v795_v12  ;;  %v909_v17 = vpack.c.bf16 %v805_v13, %v805_v13 }
 0x18c   :  { %v907_v18 = vpack.c.bf16 %v803_v14, %v803_v14  ;;  %v804_v19 = vmul.f32 %v902_v5, %v793_v15 }
 0x18d   :  { %v910_v20 = vpack.c.bf16 %v806_v16, %v806_v16  ;;  %826 = vst.msk [vmem:[%s1273_s4 + $0x8] sm:$0xf] %vm823_vm1, %v909_v17 }
 0x18e   :  { %824 = vst.msk [vmem:[%s1273_s4] sm:$0xf] %vm823_vm1, %v907_v18  ;;  %v908_v21 = vpack.c.bf16 %v804_v19, %v804_v19 }
 0x18f   :  { %827 = vst.msk [vmem:[%s1273_s4 + $0xc] sm:$0xf] %vm823_vm1, %v910_v20 }
 0x190   :  { %825 = vst.msk [vmem:[%s1273_s4 + $0x4] sm:$0xf] %vm823_vm1, %v908_v21 }

// kernel: tile.21
= control target key start
LH: loop header
LB: loop body
LE: loop exit
PB: predicated region body
PF: predicated region fallthrough
CT: control target
= control target key end

     0   :  { %s22_s0 = inlined_call_operand.vmem [shape: f32[16], index: 0, kind: input, shape index: {}]   ;;  %s23_s1 = inlined_call_operand.vmem [shape: f32[4,16], index: 1, kind: output, shape index: {}]  }
   0x1   :  { %v4_v0 = vld [vmem:[%s22_s0] ss:$0 sm:$0xff] }
   0x2   :  { %5 = vst [vmem:[%s23_s1] sm:$0xf] %v4_v0 }

// kernel: tile.0
= control target key start
LH: loop header
LB: loop body
LE: loop exit
PB: predicated region body
PF: predicated region fallthrough
CT: control target
= control target key end

     0   :  { %s176_s8 = smov 125   ;;  %s177_s9 = smov 126   ;;  %vm7_vm0 = vcmask 7168   ;;  %s331_s0 = inlined_call_operand.vmem [shape: f32[4,16], index: 0, kind: input, shape index: {}]   ;;  %s332_s1 = inlined_call_operand.vmem [shape: f32[64,1], index: 1, kind: output, shape index: {}]  }
   0x1   :  { %v4_v0 = vld [vmem:[%s331_s0] sm:$0xf]  ;;  %s175_s0 = smov 127   ;;  %s178_s10 = smov 124  }
   0x2   :  { %5 = vst [vmem:[#allocation0] sm:$0xf] %v4_v0  ;;  %s179_s11 = smov 123   ;;  %s180_s12 = smov 122  }
   0x3   :  { %s181_s13 = smov 121   ;;  %s182_s14 = smov 120  }
   0x4   :  { %s183_s19 = smov 119   ;;  %s184_s20 = smov 118  }
   0x5   :  { %s185_s21 = smov 117   ;;  %s186_s22 = smov 116  }
   0x6   :  { %s187_s23 = smov 115   ;;  %s188_s24 = smov 114  }
   0x7   :  { %s189_s25 = smov 113  }
   0x9   :  { %v10_v1 = vld [vmem:[#allocation0] sm:$0xf]  }
   0xa   :  { %v26_v2 = vld [vmem:[#allocation0] sm:$0xf]   ;;  %11 = vrot.lane.b32.xlu0 %v10_v1, %s175_s0 }
   0xb   :  { %27 = vrot.lane.b32.xlu1 %v26_v2, %s176_s8  ;;  %v18_v3 = vld [vmem:[#allocation0] sm:$0xf]  }
   0xc   :  { %v34_v4 = vld [vmem:[#allocation0] sm:$0xf]  }
   0xd   :  { %v42_v5 = vld [vmem:[#allocation0] sm:$0xf]  }
   0xe   :  { %19 = vrot.lane.b32.xlu0 %v18_v3, %s177_s9  ;;  %v50_v6 = vld [vmem:[#allocation0] sm:$0xf]  }
   0xf   :  { %35 = vrot.lane.b32.xlu1 %v34_v4, %s178_s10  ;;  %v58_v7 = vld [vmem:[#allocation0] sm:$0xf]  }
  0x10   :  { %v66_v8 = vld [vmem:[#allocation0] sm:$0xf]  }
  0x11   :  { %v74_v9 = vld [vmem:[#allocation0] sm:$0xf]  }
  0x12   :  { %43 = vrot.lane.b32.xlu0 %v42_v5, %s179_s11  ;;  %v82_v10 = vld [vmem:[#allocation0] sm:$0xf]  }
  0x13   :  { %51 = vrot.lane.b32.xlu1 %v50_v6, %s180_s12  ;;  %v6_v11 = vld [vmem:[#allocation0] sm:$0xf]  }
  0x14   :  { %8 = vst.msk [vmem:[%s332_s1] ss:$16 sm:$0x3] %vm7_vm0, %v6_v11   ;;  %9 = vst.msk [vmem:[%s332_s1] ss:$16 sm:$0xc] %vm7_vm0, %v6_v11  }
  0x15   :  { %v90_v12 = vld [vmem:[#allocation0] sm:$0xf]  }
  0x16   :  { %59 = vrot.lane.b32.xlu0 %v58_v7, %s181_s13  ;;  %v98_v13 = vld [vmem:[#allocation0] sm:$0xf]  }
  0x17   :  { %67 = vrot.lane.b32.xlu1 %v66_v8, %s182_s14  ;;  %v106_v14 = vld [vmem:[#allocation0] sm:$0xf]  }
  0x18   :  { %v114_v15 = vld [vmem:[#allocation0] sm:$0xf]  }
  0x19   :  { %v122_v16 = vld [vmem:[#allocation0] sm:$0xf]  }
  0x1a   :  { %75 = vrot.lane.b32.xlu0 %v74_v9, %s183_s19 }
  0x1b   :  { %83 = vrot.lane.b32.xlu1 %v82_v10, %s184_s20 }
  0x1e   :  { %91 = vrot.lane.b32.xlu0 %v90_v12, %s185_s21 }
  0x1f   :  { %99 = vrot.lane.b32.xlu1 %v98_v13, %s186_s22 }
  0x22   :  { %107 = vrot.lane.b32.xlu0 %v106_v14, %s187_s23 }
  0x23   :  { %115 = vrot.lane.b32.xlu1 %v114_v15, %s188_s24 }
  0x26   :  { %123 = vrot.lane.b32.xlu0 %v122_v16, %s189_s25 }
  0x7c   :  { %v12_v17 = vpop.permute.xlu0 %11  }
  0x7d   :  { %v28_v18 = vpop.permute.xlu1 %27   ;;  %130 = vst.msk [vmem:[%s332_s1 + $0x1] ss:$16 sm:$0x3] %vm7_vm0, %v12_v17   ;;  %131 = vst.msk [vmem:[%s332_s1 + $0x1] ss:$16 sm:$0xc] %vm7_vm0, %v12_v17  }
  0x7e   :  { %134 = vst.msk [vmem:[%s332_s1 + $0x3] ss:$16 sm:$0x3] %vm7_vm0, %v28_v18   ;;  %135 = vst.msk [vmem:[%s332_s1 + $0x3] ss:$16 sm:$0xc] %vm7_vm0, %v28_v18  }
  0x80   :  { %v20_v19 = vpop.permute.xlu0 %19  }
  0x81   :  { %v36_v20 = vpop.permute.xlu1 %35   ;;  %132 = vst.msk [vmem:[%s332_s1 + $0x2] ss:$16 sm:$0x3] %vm7_vm0, %v20_v19   ;;  %133 = vst.msk [vmem:[%s332_s1 + $0x2] ss:$16 sm:$0xc] %vm7_vm0, %v20_v19  }
  0x82   :  { %136 = vst.msk [vmem:[%s332_s1 + $0x4] ss:$16 sm:$0x3] %vm7_vm0, %v36_v20   ;;  %137 = vst.msk [vmem:[%s332_s1 + $0x4] ss:$16 sm:$0xc] %vm7_vm0, %v36_v20  }
  0x84   :  { %v44_v21 = vpop.permute.xlu0 %43  }
  0x85   :  { %v52_v22 = vpop.permute.xlu1 %51   ;;  %138 = vst.msk [vmem:[%s332_s1 + $0x5] ss:$16 sm:$0x3] %vm7_vm0, %v44_v21   ;;  %139 = vst.msk [vmem:[%s332_s1 + $0x5] ss:$16 sm:$0xc] %vm7_vm0, %v44_v21  }
  0x86   :  { %140 = vst.msk [vmem:[%s332_s1 + $0x6] ss:$16 sm:$0x3] %vm7_vm0, %v52_v22   ;;  %141 = vst.msk [vmem:[%s332_s1 + $0x6] ss:$16 sm:$0xc] %vm7_vm0, %v52_v22  }
  0x88   :  { %v60_v23 = vpop.permute.xlu0 %59  }
  0x89   :  { %v68_v24 = vpop.permute.xlu1 %67   ;;  %142 = vst.msk [vmem:[%s332_s1 + $0x7] ss:$16 sm:$0x3] %vm7_vm0, %v60_v23   ;;  %143 = vst.msk [vmem:[%s332_s1 + $0x7] ss:$16 sm:$0xc] %vm7_vm0, %v60_v23  }
  0x8a   :  { %144 = vst.msk [vmem:[%s332_s1 + $0x8] ss:$16 sm:$0x3] %vm7_vm0, %v68_v24   ;;  %145 = vst.msk [vmem:[%s332_s1 + $0x8] ss:$16 sm:$0xc] %vm7_vm0, %v68_v24  }
  0x8c   :  { %v76_v25 = vpop.permute.xlu0 %75  }
  0x8d   :  { %v84_v26 = vpop.permute.xlu1 %83   ;;  %146 = vst.msk [vmem:[%s332_s1 + $0x9] ss:$16 sm:$0x3] %vm7_vm0, %v76_v25   ;;  %147 = vst.msk [vmem:[%s332_s1 + $0x9] ss:$16 sm:$0xc] %vm7_vm0, %v76_v25  }
  0x8e   :  { %148 = vst.msk [vmem:[%s332_s1 + $0xa] ss:$16 sm:$0x3] %vm7_vm0, %v84_v26   ;;  %149 = vst.msk [vmem:[%s332_s1 + $0xa] ss:$16 sm:$0xc] %vm7_vm0, %v84_v26  }
  0x90   :  { %v92_v27 = vpop.permute.xlu0 %91  }
  0x91   :  { %v100_v28 = vpop.permute.xlu1 %99   ;;  %150 = vst.msk [vmem:[%s332_s1 + $0xb] ss:$16 sm:$0x3] %vm7_vm0, %v92_v27   ;;  %151 = vst.msk [vmem:[%s332_s1 + $0xb] ss:$16 sm:$0xc] %vm7_vm0, %v92_v27  }
  0x92   :  { %152 = vst.msk [vmem:[%s332_s1 + $0xc] ss:$16 sm:$0x3] %vm7_vm0, %v100_v28   ;;  %153 = vst.msk [vmem:[%s332_s1 + $0xc] ss:$16 sm:$0xc] %vm7_vm0, %v100_v28  }
  0x94   :  { %v108_v29 = vpop.permute.xlu0 %107  }
  0x95   :  { %v116_v30 = vpop.permute.xlu1 %115   ;;  %154 = vst.msk [vmem:[%s332_s1 + $0xd] ss:$16 sm:$0x3] %vm7_vm0, %v108_v29   ;;  %155 = vst.msk [vmem:[%s332_s1 + $0xd] ss:$16 sm:$0xc] %vm7_vm0, %v108_v29  }
  0x96   :  { %156 = vst.msk [vmem:[%s332_s1 + $0xe] ss:$16 sm:$0x3] %vm7_vm0, %v116_v30   ;;  %157 = vst.msk [vmem:[%s332_s1 + $0xe] ss:$16 sm:$0xc] %vm7_vm0, %v116_v30  }
  0x98   :  { %v124_v31 = vpop.permute.xlu0 %123  }
  0x99   :  { %158 = vst.msk [vmem:[%s332_s1 + $0xf] ss:$16 sm:$0x3] %vm7_vm0, %v124_v31   ;;  %159 = vst.msk [vmem:[%s332_s1 + $0xf] ss:$16 sm:$0xc] %vm7_vm0, %v124_v31  }

// kernel: fcn_forward.8
= control target key start
LH: loop header
LB: loop body
LE: loop exit
PB: predicated region body
PF: predicated region fallthrough
CT: control target
= control target key end

     0   :  { %v418_v1 = vmov 0   ;;  %vm291_vm0 = vcmask 257024   ;;  %s548_s0 = inlined_call_operand.vmem [shape: bf16[128,32], index: 0, kind: input, shape index: {}]   ;;  %s549_s1 = inlined_call_operand.vmem [shape: bf16[64,128], index: 1, kind: input, shape index: {}]   ;;  %s550_s2 = inlined_call_operand.vmem [shape: f32[64,1], index: 2, kind: input, shape index: {}]   ;;  %s551_s3 = inlined_call_operand.vmem [shape: bf16[64,32], index: 3, kind: input, shape index: {}]   ;;  %s552_s4 = inlined_call_operand.vmem [shape: bf16[64,32], index: 4, kind: output, shape index: {}]  }
   0x1   :  { %v406_v0 = vld [vmem:[%s548_s0] sm:$0xff]   ;;  %405 = vset.pattern.permute.xlu1 %v418_v1  ;;  %404 = vset.pattern.permute.xlu0 %v418_v1  ;;  %v407_v2 = vld [vmem:[%s548_s0 + $0x8] sm:$0xff]   ;;  %v408_v3 = vld [vmem:[%s548_s0 + $0x10] sm:$0xff]  }
   0x2   :  { %363 = vmatprep.subr.bf16.mxu0 %v406_v0  ;;  %387 = vmatprep.subr.bf16.mxu1 %v406_v0  ;;  %v409_v4 = vld [vmem:[%s548_s0 + $0x18] sm:$0xff]   ;;  %v414_v5 = vld [vmem:[%s549_s1] sm:$0xff]   ;;  %v415_v6 = vld [vmem:[%s549_s1 + $0x10] sm:$0xff]  }
   0x3   :  { %364 = vmatpush3.bf16.msra.mxu0 %v406_v0  ;;  %395 = vmatpush3.bf16.msra.mxu1 %v406_v0  ;;  %v410_v7 = vld [vmem:[%s548_s0 + $0x20] sm:$0xff]   ;;  %v44_v8 = vld [vmem:[%s550_s2 + $0x10] sm:$0xff]  ;;  %v45_v10 = vld [vmem:[%s550_s2 + $0x18] sm:$0xff] }
   0x4   :  { %365 = vmatprep.subr.bf16.mxu0 %v407_v2  ;;  %388 = vmatprep.subr.bf16.mxu1 %v407_v2  ;;  %v42_v9 = vld [vmem:[%s550_s2] sm:$0xff]  ;;  %v43_v11 = vld [vmem:[%s550_s2 + $0x8] sm:$0xff]  ;;  %v412_v15 = vld [vmem:[%s548_s0 + $0x30] sm:$0xff]  }
   0x5   :  { %379 = vmatprep.mubr.bf16.mxu0 %v414_v5  ;;  %383 = vmatprep.mubr.bf16.mxu1 %v415_v6  ;;  %v411_v12 = vld [vmem:[%s548_s0 + $0x28] sm:$0xff]   ;;  %v46_v14 = vld [vmem:[%s550_s2 + $0x20] sm:$0xff]  ;;  %v49_v16 = vld [vmem:[%s550_s2 + $0x38] sm:$0xff] }
   0x6   :  { %62 = vperm.xlu1 %405, %v44_v8   ;;  %52 = vperm.xlu0 %404, %v42_v9   ;;  %v47_v13 = vld [vmem:[%s550_s2 + $0x28] sm:$0xff]  ;;  %v48_v17 = vld [vmem:[%s550_s2 + $0x30] sm:$0xff]  ;;  %v413_v18 = vld [vmem:[%s548_s0 + $0x38] sm:$0xff]  }
   0x7   :  { %366 = vmatpush3.bf16.msra.mxu0 %v407_v2  ;;  %396 = vmatpush3.bf16.msra.mxu1 %v407_v2  ;;  %v416_v19 = vld [vmem:[%s549_s1 + $0x8] sm:$0xff]   ;;  %v417_v20 = vld [vmem:[%s549_s1 + $0x18] sm:$0xff]   ;;  %v333_v29 = vld [vmem:[%s551_s3] sm:$0xff]  }
   0x8   :  { %367 = vmatprep.subr.bf16.mxu0 %v408_v3  ;;  %389 = vmatprep.subr.bf16.mxu1 %v408_v3  ;;  %v348_v27 = vld [vmem:[%s551_s3 + $0x8] sm:$0xff]   ;;  %v350_v28 = vld [vmem:[%s551_s3 + $0x18] sm:$0xff]   ;;  %v349_v30 = vld [vmem:[%s551_s3 + $0x10] sm:$0xff]   ;;  %v334_v37 = vunpack.c.l.bf16 %v333_v29  ;;  %v335_v45 = vunpack.c.h.bf16 %v333_v29 }
   0x9   :  { %v338_v33 = vunpack.c.l.bf16 %v348_v27  ;;  %v346_v34 = vunpack.c.l.bf16 %v350_v28  ;;  %v342_v38 = vunpack.c.l.bf16 %v349_v30  ;;  %v339_v39 = vunpack.c.h.bf16 %v348_v27 }
   0xa   :  { %67 = vperm.xlu1 %405, %v45_v10   ;;  %57 = vperm.xlu0 %404, %v43_v11   ;;  %v347_v44 = vunpack.c.h.bf16 %v350_v28  ;;  %v343_v50 = vunpack.c.h.bf16 %v349_v30 }
   0xb   :  { %368 = vmatpush3.bf16.msra.mxu0 %v408_v3  ;;  %397 = vmatpush3.bf16.msra.mxu1 %v408_v3 }
   0xc   :  { %369 = vmatprep.subr.bf16.mxu0 %v409_v4  ;;  %390 = vmatprep.subr.bf16.mxu1 %v409_v4 }
   0xe   :  { %77 = vperm.xlu1 %405, %v47_v13   ;;  %72 = vperm.xlu0 %404, %v46_v14  }
   0xf   :  { %370 = vmatpush3.bf16.msra.mxu0 %v409_v4  ;;  %398 = vmatpush3.bf16.msra.mxu1 %v409_v4 }
  0x10   :  { %371 = vmatprep.subr.bf16.mxu0 %v410_v7  ;;  %391 = vmatprep.subr.bf16.mxu1 %v410_v7 }
  0x12   :  { %87 = vperm.xlu1 %405, %v49_v16   ;;  %82 = vperm.xlu0 %404, %v48_v17  }
  0x13   :  { %372 = vmatpush3.bf16.msra.mxu0 %v410_v7  ;;  %399 = vmatpush3.bf16.msra.mxu1 %v410_v7 }
  0x14   :  { %373 = vmatprep.subr.bf16.mxu0 %v411_v12  ;;  %392 = vmatprep.subr.bf16.mxu1 %v411_v12 }
  0x17   :  { %374 = vmatpush3.bf16.msra.mxu0 %v411_v12  ;;  %400 = vmatpush3.bf16.msra.mxu1 %v411_v12 }
  0x18   :  { %375 = vmatprep.subr.bf16.mxu0 %v412_v15  ;;  %393 = vmatprep.subr.bf16.mxu1 %v412_v15 }
  0x1b   :  { %376 = vmatpush3.bf16.msra.mxu0 %v412_v15  ;;  %401 = vmatpush3.bf16.msra.mxu1 %v412_v15 }
  0x1c   :  { %377 = vmatprep.subr.bf16.mxu0 %v413_v18  ;;  %394 = vmatprep.subr.bf16.mxu1 %v413_v18 }
  0x1f   :  { %378 = vmatpush3.bf16.msra.mxu0 %v413_v18  ;;  %402 = vmatpush3.bf16.msra.mxu1 %v413_v18 }
  0x22   :  { %380 = vmatmul.mubr.bf16.vlgmr.msra.gmra.mrb[0].mxu0 %v416_v19  ;;  %384 = vmatmul.mubr.bf16.vlgmr.msra.gmra.mrb[0].mxu1 %v417_v20 }
  0x85   :  { %v63_v21 = vpop.permute.xlu1 %62  ;;  %v53_v22 = vpop.permute.xlu0 %52 }
  0x89   :  { %v68_v23 = vpop.permute.xlu1 %67  ;;  %v58_v24 = vpop.permute.xlu0 %57 }
  0x8d   :  { %v78_v25 = vpop.permute.xlu1 %77  ;;  %v73_v26 = vpop.permute.xlu0 %72 }
  0x91   :  { %v88_v31 = vpop.permute.xlu1 %87  ;;  %v83_v32 = vpop.permute.xlu0 %82 }
  0xf5   :  { %v381_v35 = vpop.f32.mrb[0].mxu0  ;;  %v385_v36 = vpop.f32.mrb[0].mxu1 }
  0xf6   :  { %v205_v40 = vadd.f32 %v381_v35, %v63_v21  ;;  %v221_v41 = vadd.f32 %v385_v36, %v83_v32  ;;  %v196_v42 = vpop.f32.mrb[1].mxu0  ;;  %v212_v43 = vpop.f32.mrb[1].mxu1 }
  0xf7   :  { %v197_v46 = vadd.f32 %v196_v42, %v53_v22  ;;  %v213_v47 = vadd.f32 %v212_v43, %v73_v26  ;;  %v382_v48 = vpop.f32.mrb[2].mxu0  ;;  %v386_v49 = vpop.f32.mrb[2].mxu1 }
  0xf8   :  { %v245_v51 = vadd.f32 %v338_v33, %v205_v40  ;;  %v249_v52 = vadd.f32 %v346_v34, %v221_v41  ;;  %v208_v53 = vadd.f32 %v382_v48, %v68_v23  ;;  %v224_v54 = vadd.f32 %v386_v49, %v88_v31  ;;  %v199_v55 = vpop.f32.mrb[3].mxu0  ;;  %v215_v56 = vpop.f32.mrb[3].mxu1 }
  0xf9   :  { %v243_v57 = vadd.f32 %v334_v37, %v197_v46  ;;  %v247_v58 = vadd.f32 %v342_v38, %v213_v47  ;;  %v200_v59 = vadd.f32 %v199_v55, %v58_v24  ;;  %v216_v60 = vadd.f32 %v215_v56, %v78_v25 }
  0xfa   :  { %v253_v61 = vmax.f32 %v245_v51, 0.0  ;;  %v257_v62 = vmax.f32 %v249_v52, 0.0  ;;  %v246_v63 = vadd.f32 %v339_v39, %v208_v53  ;;  %v250_v0 = vadd.f32 %v347_v44, %v224_v54 }
  0xfb   :  { %v251_v1 = vmax.f32 %v243_v57, 0.0  ;;  %v255_v2 = vmax.f32 %v247_v58, 0.0  ;;  %v244_v3 = vadd.f32 %v335_v45, %v200_v59  ;;  %v248_v4 = vadd.f32 %v343_v50, %v216_v60 }
  0xfc   :  { %v326_v5 = vpack.c.bf16 %v253_v61, %v253_v61  ;;  %v330_v6 = vpack.c.bf16 %v257_v62, %v257_v62  ;;  %v254_v7 = vmax.f32 %v246_v63, 0.0  ;;  %v258_v8 = vmax.f32 %v250_v0, 0.0 }
  0xfd   :  { %v324_v9 = vpack.c.bf16 %v251_v1, %v251_v1  ;;  %v328_v10 = vpack.c.bf16 %v255_v2, %v255_v2  ;;  %v252_v11 = vmax.f32 %v244_v3, 0.0  ;;  %v256_v12 = vmax.f32 %v248_v4, 0.0 }
  0xfe   :  { %294 = vst.msk [vmem:[%s552_s4 + $0x8] sm:$0xf] %vm291_vm0, %v326_v5  ;;  %298 = vst.msk [vmem:[%s552_s4 + $0x18] sm:$0xf] %vm291_vm0, %v330_v6  ;;  %v327_v13 = vpack.c.bf16 %v254_v7, %v254_v7  ;;  %v331_v14 = vpack.c.bf16 %v258_v8, %v258_v8 }
  0xff   :  { %292 = vst.msk [vmem:[%s552_s4] sm:$0xf] %vm291_vm0, %v324_v9  ;;  %296 = vst.msk [vmem:[%s552_s4 + $0x10] sm:$0xf] %vm291_vm0, %v328_v10  ;;  %v325_v15 = vpack.c.bf16 %v252_v11, %v252_v11  ;;  %v329_v16 = vpack.c.bf16 %v256_v12, %v256_v12 }
 0x100   :  { %295 = vst.msk [vmem:[%s552_s4 + $0xc] sm:$0xf] %vm291_vm0, %v327_v13  ;;  %299 = vst.msk [vmem:[%s552_s4 + $0x1c] sm:$0xf] %vm291_vm0, %v331_v14 }
 0x101   :  { %293 = vst.msk [vmem:[%s552_s4 + $0x4] sm:$0xf] %vm291_vm0, %v325_v15  ;;  %297 = vst.msk [vmem:[%s552_s4 + $0x14] sm:$0xf] %vm291_vm0, %v329_v16 }

// kernel: tile.26
= control target key start
LH: loop header
LB: loop body
LE: loop exit
PB: predicated region body
PF: predicated region fallthrough
CT: control target
= control target key end

     0   :  { %s28_s0 = inlined_call_operand.vmem [shape: f32[6], index: 0, kind: input, shape index: {}]   ;;  %s29_s1 = inlined_call_operand.vmem [shape: f32[16,6], index: 1, kind: output, shape index: {}]  }
   0x1   :  { %v4_v0 = vld [vmem:[%s28_s0] ss:$0 sm:$0xff] }
   0x2   :  { %5 = vst [vmem:[%s29_s1] sm:$0xff] %v4_v0  ;;  %8 = vst [vmem:[%s29_s1 + $0x8] sm:$0xff] %v4_v0 }

// kernel: tile.1
= control target key start
LH: loop header
LB: loop body
LE: loop exit
PB: predicated region body
PF: predicated region fallthrough
CT: control target
= control target key end

     0   :  { %s166_s10 = smov 126   ;;  %vm3_vm0 = vcmask 7168   ;;  %s167_s11 = smov 127   ;;  %s345_s0 = inlined_call_operand.vmem [shape: f32[16,6], index: 0, kind: input, shape index: {}]   ;;  %s346_s1 = inlined_call_operand.vmem [shape: f32[96,1], index: 1, kind: output, shape index: {}]  }
   0x1   :  { %v33_v0 = vld.sshfl [vmem:[%s345_s0] sm:$0xff pattern:$0x27c16b05]   ;;  %v134_v4 = vld.sshfl [vmem:[%s345_s0 + $0x3] sm:$0xff pattern:$0x7c16b05a]  }
   0x2   :  { %v10_v1 = vld.sshfl [vmem:[%s345_s0] sm:$0xff pattern:$0xd27c16b0]   ;;  %34 = vrot.lane.b32.xlu1 %v33_v0, %s166_s10  ;;  %v127_v5 = vld.sshfl [vmem:[%s345_s0 + $0x3] sm:$0xff pattern:$0x27c16b05]  }
   0x3   :  { %11 = vrot.lane.b32.xlu0 %v10_v1, %s167_s11  ;;  %v2_v2 = vld [vmem:[%s345_s0] sm:$0xff]   ;;  %v121_v3 = vld [vmem:[%s345_s0 + $0x8] sm:$0xff]   ;;  %s168_s24 = smov 125   ;;  %s170_s29 = smov 123  }
   0x4   :  { %4 = vst.msk [vmem:[%s346_s1] ss:$6 sm:$0xff] %vm3_vm0, %v2_v2   ;;  %122 = vst.msk [vmem:[%s346_s1 + $0x30] ss:$6 sm:$0xff] %vm3_vm0, %v121_v3  }
   0x5   :  { %v148_v6 = vld.sshfl [vmem:[%s345_s0 + $0x2] sm:$0xff pattern:$0xd27c16b0]   ;;  %v75_v7 = vld.sshfl [vmem:[%s345_s0] sm:$0xff pattern:$0x7c16b05a]  }
   0x6   :  { %45 = vrot.lane.b32.xlu1 %v134_v4, %s166_s10  ;;  %s169_s0 = smov 124  }
   0x7   :  { %24 = vrot.lane.b32.xlu0 %v127_v5, %s167_s11 }
   0xa   :  { %66 = vrot.lane.b32.xlu1 %v134_v4, %s168_s24 }
   0xb   :  { %55 = vrot.lane.b32.xlu0 %v33_v0, %s168_s24 }
   0xe   :  { %87 = vrot.lane.b32.xlu1 %v148_v6, %s169_s0 }
   0xf   :  { %76 = vrot.lane.b32.xlu0 %v75_v7, %s169_s0 }
  0x12   :  { %110 = vrot.lane.b32.xlu1 %v148_v6, %s170_s29 }
  0x13   :  { %99 = vrot.lane.b32.xlu0 %v75_v7, %s170_s29 }
  0x74   :  { %v35_v8 = vpop.permute.xlu1 %34  }
  0x75   :  { %v12_v9 = vpop.permute.xlu0 %11   ;;  %131 = vst.msk [vmem:[%s346_s1 + $0x20] ss:$-30 sm:$0x3] %vm3_vm0, %v35_v8   ;;  %132 = vst.msk [vmem:[%s346_s1 + $0x80] ss:$-30 sm:$0x1c] %vm3_vm0, %v35_v8  }
  0x76   :  { %133 = vst.msk [vmem:[%s346_s1 + $0xe0] ss:$-30 sm:$0xe0] %vm3_vm0, %v35_v8   ;;  %123 = vst.msk [vmem:[%s346_s1 + $0x1] ss:$66 sm:$0x3] %vm3_vm0, %v12_v9  }
  0x77   :  { %124 = vst.msk [vmem:[%s346_s1 + $0x61] ss:$-30 sm:$0xc] %vm3_vm0, %v12_v9   ;;  %125 = vst.msk [vmem:[%s346_s1 + $0xc1] ss:$-30 sm:$0x70] %vm3_vm0, %v12_v9  }
  0x78   :  { %126 = vst.msk [vmem:[%s346_s1 + $0x48] sm:$0x80] %vm3_vm0, %v12_v9   ;;  %v46_v10 = vpop.permute.xlu1 %45  }
  0x79   :  { %v25_v11 = vpop.permute.xlu0 %24   ;;  %135 = vst.msk [vmem:[%s346_s1 + $0x50] ss:$-30 sm:$0x7] %vm3_vm0, %v46_v10   ;;  %136 = vst.msk [vmem:[%s346_s1 + $0xb0] ss:$-30 sm:$0x38] %vm3_vm0, %v46_v10  }
  0x7a   :  { %137 = vst.msk [vmem:[%s346_s1 + $0x110] ss:$-30 sm:$0xc0] %vm3_vm0, %v46_v10   ;;  %128 = vst.msk [vmem:[%s346_s1 + $0x31] ss:$-30 sm:$0x3] %vm3_vm0, %v25_v11  }
  0x7b   :  { %129 = vst.msk [vmem:[%s346_s1 + $0x91] ss:$-30 sm:$0x1c] %vm3_vm0, %v25_v11   ;;  %130 = vst.msk [vmem:[%s346_s1 + $0xf1] ss:$-30 sm:$0xe0] %vm3_vm0, %v25_v11  }
  0x7c   :  { %v67_v12 = vpop.permute.xlu1 %66  }
  0x7d   :  { %v56_v13 = vpop.permute.xlu0 %55   ;;  %142 = vst.msk [vmem:[%s346_s1 + $0x51] ss:$-30 sm:$0x7] %vm3_vm0, %v67_v12   ;;  %143 = vst.msk [vmem:[%s346_s1 + $0xb1] ss:$-30 sm:$0x38] %vm3_vm0, %v67_v12  }
  0x7e   :  { %144 = vst.msk [vmem:[%s346_s1 + $0x111] ss:$-30 sm:$0xc0] %vm3_vm0, %v67_v12   ;;  %138 = vst.msk [vmem:[%s346_s1 + $0x21] ss:$-30 sm:$0x3] %vm3_vm0, %v56_v13  }
  0x7f   :  { %139 = vst.msk [vmem:[%s346_s1 + $0x81] ss:$-30 sm:$0x1c] %vm3_vm0, %v56_v13   ;;  %140 = vst.msk [vmem:[%s346_s1 + $0xe1] ss:$-30 sm:$0xe0] %vm3_vm0, %v56_v13  }
  0x80   :  { %v88_v14 = vpop.permute.xlu1 %87  }
  0x81   :  { %v77_v15 = vpop.permute.xlu0 %76   ;;  %149 = vst.msk [vmem:[%s346_s1 + $0x10] ss:$66 sm:$0x3] %vm3_vm0, %v88_v14   ;;  %150 = vst.msk [vmem:[%s346_s1 + $0x70] ss:$-30 sm:$0xc] %vm3_vm0, %v88_v14  }
  0x82   :  { %151 = vst.msk [vmem:[%s346_s1 + $0xd0] ss:$-30 sm:$0x70] %vm3_vm0, %v88_v14   ;;  %152 = vst.msk [vmem:[%s346_s1 + $0x57] sm:$0x80] %vm3_vm0, %v88_v14  }
  0x83   :  { %145 = vst.msk [vmem:[%s346_s1 + $0x40] ss:$-30 sm:$0x7] %vm3_vm0, %v77_v15   ;;  %146 = vst.msk [vmem:[%s346_s1 + $0xa0] ss:$-30 sm:$0x38] %vm3_vm0, %v77_v15  }
  0x84   :  { %147 = vst.msk [vmem:[%s346_s1 + $0x100] ss:$-30 sm:$0xc0] %vm3_vm0, %v77_v15   ;;  %v111_v16 = vpop.permute.xlu1 %110  }
  0x85   :  { %v100_v17 = vpop.permute.xlu0 %99   ;;  %157 = vst.msk [vmem:[%s346_s1 + $0x11] ss:$66 sm:$0x3] %vm3_vm0, %v111_v16   ;;  %158 = vst.msk [vmem:[%s346_s1 + $0x71] ss:$-30 sm:$0xc] %vm3_vm0, %v111_v16  }
  0x86   :  { %159 = vst.msk [vmem:[%s346_s1 + $0xd1] ss:$-30 sm:$0x70] %vm3_vm0, %v111_v16   ;;  %160 = vst.msk [vmem:[%s346_s1 + $0x58] sm:$0x80] %vm3_vm0, %v111_v16  }
  0x87   :  { %153 = vst.msk [vmem:[%s346_s1 + $0x41] ss:$-30 sm:$0x7] %vm3_vm0, %v100_v17   ;;  %154 = vst.msk [vmem:[%s346_s1 + $0xa1] ss:$-30 sm:$0x38] %vm3_vm0, %v100_v17  }
  0x88   :  { %155 = vst.msk [vmem:[%s346_s1 + $0x101] ss:$-30 sm:$0xc0] %vm3_vm0, %v100_v17  }

// kernel: fcn_forward.9
= control target key start
LH: loop header
LB: loop body
LE: loop exit
PB: predicated region body
PF: predicated region fallthrough
CT: control target
= control target key end

     0   :  { %v518_v1 = vmov 0   ;;  %vm368_vm0 = vcmask 261120   ;;  %s710_s0 = inlined_call_operand.vmem [shape: bf16[256,32], index: 0, kind: input, shape index: {}]   ;;  %s711_s1 = inlined_call_operand.vmem [shape: bf16[96,256], index: 1, kind: input, shape index: {}]   ;;  %s712_s2 = inlined_call_operand.vmem [shape: f32[96,1], index: 2, kind: input, shape index: {}]   ;;  %s713_s3 = inlined_call_operand.vmem [shape: f32[96,32], index: 3, kind: output, shape index: {}]  }
   0x1   :  { %v484_v0 = vld [vmem:[%s710_s0 + $0x40] sm:$0xff]   ;;  %483 = vset.pattern.permute.xlu1 %v518_v1  ;;  %482 = vset.pattern.permute.xlu0 %v518_v1  ;;  %v486_v3 = vld [vmem:[%s710_s0 + $0x48] sm:$0xff]   ;;  %v488_v5 = vld [vmem:[%s710_s0 + $0x50] sm:$0xff]  }
   0x2   :  { %v485_v2 = vld [vmem:[%s710_s0] sm:$0xff]   ;;  %413 = vmatprep.subr.bf16.mxu0 %v484_v0  ;;  %465 = vmatprep.subr.bf16.mxu1 %v484_v0  ;;  %v487_v4 = vld [vmem:[%s710_s0 + $0x8] sm:$0xff]   ;;  %v489_v6 = vld [vmem:[%s710_s0 + $0x10] sm:$0xff]  }
   0x3   :  { %414 = vmatpush3.bf16.msra.mxu0 %v485_v2  ;;  %473 = vmatpush3.bf16.msra.mxu1 %v485_v2  ;;  %v490_v7 = vld [vmem:[%s710_s0 + $0x58] sm:$0xff]   ;;  %v492_v9 = vld [vmem:[%s710_s0 + $0x60] sm:$0xff]   ;;  %v494_v11 = vld [vmem:[%s710_s0 + $0x68] sm:$0xff]  }
   0x4   :  { %415 = vmatprep.subr.bf16.mxu0 %v486_v3  ;;  %466 = vmatprep.subr.bf16.mxu1 %v486_v3  ;;  %v491_v8 = vld [vmem:[%s710_s0 + $0x18] sm:$0xff]   ;;  %v493_v10 = vld [vmem:[%s710_s0 + $0x20] sm:$0xff]   ;;  %v495_v14 = vld [vmem:[%s710_s0 + $0x28] sm:$0xff]  }
   0x5   :  { %v502_v12 = vld [vmem:[%s711_s1 + $0x4] ss:$8 sps:$4 sm:$0xff]   ;;  %v505_v13 = vld [vmem:[%s711_s1 + $0x34] ss:$8 sps:$4 sm:$0xff]   ;;  %v500_v23 = vld [vmem:[%s711_s1] ss:$8 sps:$4 sm:$0xff]  }
   0x6   :  { %v496_v15 = vld [vmem:[%s710_s0 + $0x70] sm:$0xff]   ;;  %319 = vmatprep.mubr.bf16.mxu0 %v502_v12  ;;  %343 = vmatprep.mubr.bf16.mxu1 %v505_v13  ;;  %v498_v17 = vld [vmem:[%s710_s0 + $0x78] sm:$0xff]   ;;  %v59_v19 = vld [vmem:[%s712_s2] sm:$0xff] }
   0x7   :  { %416 = vmatpush3.bf16.msra.mxu0 %v487_v4  ;;  %474 = vmatpush3.bf16.msra.mxu1 %v487_v4  ;;  %v497_v16 = vld [vmem:[%s710_s0 + $0x30] sm:$0xff]   ;;  %v62_v20 = vld [vmem:[%s712_s2 + $0x18] sm:$0xff]  ;;  %v60_v21 = vld [vmem:[%s712_s2 + $0x8] sm:$0xff] }
   0x8   :  { %417 = vmatprep.subr.bf16.mxu0 %v488_v5  ;;  %467 = vmatprep.subr.bf16.mxu1 %v488_v5  ;;  %v61_v18 = vld [vmem:[%s712_s2 + $0x10] sm:$0xff]  ;;  %v499_v22 = vld [vmem:[%s710_s0 + $0x38] sm:$0xff]   ;;  %v64_v25 = vld [vmem:[%s712_s2 + $0x28] sm:$0xff] }
   0x9   :  { %83 = vperm.xlu1 %483, %v61_v18   ;;  %73 = vperm.xlu0 %482, %v59_v19   ;;  %v503_v24 = vld [vmem:[%s711_s1 + $0x30] ss:$8 sps:$4 sm:$0xff]   ;;  %v63_v26 = vld [vmem:[%s712_s2 + $0x20] sm:$0xff]  ;;  %v506_v27 = vld [vmem:[%s711_s1 + $0x14] ss:$8 sps:$4 sm:$0xff]  }
   0xa   :  { %v508_v28 = vld [vmem:[%s711_s1 + $0x44] ss:$8 sps:$4 sm:$0xff]   ;;  %v66_v29 = vld [vmem:[%s712_s2 + $0x38] sm:$0xff]  ;;  %v65_v30 = vld [vmem:[%s712_s2 + $0x30] sm:$0xff] }
   0xb   :  { %418 = vmatpush3.bf16.msra.mxu0 %v489_v6  ;;  %475 = vmatpush3.bf16.msra.mxu1 %v489_v6  ;;  %v510_v31 = vld [vmem:[%s711_s1 + $0x10] ss:$8 sps:$4 sm:$0xff]   ;;  %v511_v32 = vld [vmem:[%s711_s1 + $0x40] ss:$8 sps:$4 sm:$0xff]   ;;  %v512_v35 = vld [vmem:[%s711_s1 + $0x24] ss:$8 sps:$4 sm:$0xff]  }
   0xc   :  { %419 = vmatprep.subr.bf16.mxu0 %v490_v7  ;;  %468 = vmatprep.subr.bf16.mxu1 %v490_v7  ;;  %v68_v33 = vld [vmem:[%s712_s2 + $0x48] sm:$0xff]  ;;  %v67_v34 = vld [vmem:[%s712_s2 + $0x40] sm:$0xff]  ;;  %v514_v36 = vld [vmem:[%s711_s1 + $0x54] ss:$8 sps:$4 sm:$0xff]  }
   0xd   :  { %88 = vperm.xlu1 %483, %v62_v20   ;;  %78 = vperm.xlu0 %482, %v60_v21   ;;  %v70_v37 = vld [vmem:[%s712_s2 + $0x58] sm:$0xff]  ;;  %v69_v38 = vld [vmem:[%s712_s2 + $0x50] sm:$0xff]  ;;  %v516_v39 = vld [vmem:[%s711_s1 + $0x20] ss:$8 sps:$4 sm:$0xff]  }
   0xe   :  { %v517_v40 = vld [vmem:[%s711_s1 + $0x50] ss:$8 sps:$4 sm:$0xff]  }
   0xf   :  { %420 = vmatpush3.bf16.msra.mxu0 %v491_v8  ;;  %476 = vmatpush3.bf16.msra.mxu1 %v491_v8 }
  0x10   :  { %421 = vmatprep.subr.bf16.mxu0 %v492_v9  ;;  %469 = vmatprep.subr.bf16.mxu1 %v492_v9 }
  0x11   :  { %98 = vperm.xlu1 %483, %v64_v25   ;;  %93 = vperm.xlu0 %482, %v63_v26  }
  0x13   :  { %422 = vmatpush3.bf16.msra.mxu0 %v493_v10  ;;  %477 = vmatpush3.bf16.msra.mxu1 %v493_v10 }
  0x14   :  { %423 = vmatprep.subr.bf16.mxu0 %v494_v11  ;;  %470 = vmatprep.subr.bf16.mxu1 %v494_v11 }
  0x15   :  { %108 = vperm.xlu1 %483, %v66_v29   ;;  %103 = vperm.xlu0 %482, %v65_v30  }
  0x17   :  { %424 = vmatpush3.bf16.msra.mxu0 %v495_v14  ;;  %478 = vmatpush3.bf16.msra.mxu1 %v495_v14 }
  0x18   :  { %425 = vmatprep.subr.bf16.mxu0 %v496_v15  ;;  %471 = vmatprep.subr.bf16.mxu1 %v496_v15 }
  0x19   :  { %118 = vperm.xlu1 %483, %v68_v33   ;;  %113 = vperm.xlu0 %482, %v67_v34  }
  0x1b   :  { %426 = vmatpush3.bf16.msra.mxu0 %v497_v16  ;;  %479 = vmatpush3.bf16.msra.mxu1 %v497_v16 }
  0x1c   :  { %427 = vmatprep.subr.bf16.mxu0 %v498_v17  ;;  %472 = vmatprep.subr.bf16.mxu1 %v498_v17 }
  0x1d   :  { %128 = vperm.xlu1 %483, %v70_v37   ;;  %123 = vperm.xlu0 %482, %v69_v38  }
  0x1f   :  { %428 = vmatpush3.bf16.msra.mxu0 %v499_v22  ;;  %480 = vmatpush3.bf16.msra.mxu1 %v499_v22 }
  0x22   :  { %320 = vmatmul.mubr.bf16.vlgmr.msra.gmra.mrb[0].mxu0 %v500_v23  ;;  %344 = vmatmul.mubr.bf16.vlgmr.msra.gmra.mrb[0].mxu1 %v503_v24 }
  0x23   :  { %327 = vmatprep.mubr.bf16.mxu0 %v506_v27  ;;  %351 = vmatprep.mubr.bf16.mxu1 %v508_v28 }
  0x2a   :  { %328 = vmatmul.mubr.bf16.gmra.mrb[4].mxu0 %v510_v31  ;;  %352 = vmatmul.mubr.bf16.gmra.mrb[4].mxu1 %v511_v32 }
  0x2b   :  { %335 = vmatprep.mubr.bf16.mxu0 %v512_v35  ;;  %359 = vmatprep.mubr.bf16.mxu1 %v514_v36 }
  0x32   :  { %336 = vmatmul.mubr.bf16.gmra.mrb[8].mxu0 %v516_v39  ;;  %360 = vmatmul.mubr.bf16.gmra.mrb[8].mxu1 %v517_v40 }
  0x88   :  { %v74_v41 = vpop.permute.xlu0 %73  ;;  %v84_v42 = vpop.permute.xlu1 %83 }
  0x8c   :  { %v79_v43 = vpop.permute.xlu0 %78  ;;  %v89_v44 = vpop.permute.xlu1 %88 }
  0x90   :  { %v94_v45 = vpop.permute.xlu0 %93  ;;  %v659_v46 = vpop.permute.xlu1 %98 }
  0x94   :  { %v104_v47 = vpop.permute.xlu0 %103  ;;  %v109_v62 = vpop.permute.xlu1 %108 }
  0x98   :  { %v114_v1 = vpop.permute.xlu0 %113  ;;  %v119_v16 = vpop.permute.xlu1 %118 }
  0x9c   :  { %v124_v19 = vpop.permute.xlu0 %123  ;;  %v129_v34 = vpop.permute.xlu1 %128 }
  0xf5   :  { %v429_v48 = vpop.f32.mrb[0].mxu0  ;;  %v447_v49 = vpop.f32.mrb[0].mxu1 }
  0xf6   :  { %v430_v50 = vpop.f32.mrb[1].mxu0  ;;  %v448_v51 = vpop.f32.mrb[1].mxu1 }
  0xf7   :  { %v431_v52 = vadd.f32 %v430_v50, %v429_v48  ;;  %v449_v53 = vadd.f32 %v448_v51, %v447_v49  ;;  %v432_v54 = vpop.f32.mrb[2].mxu0  ;;  %v450_v55 = vpop.f32.mrb[2].mxu1 }
  0xf8   :  { %v433_v56 = vpop.f32.mrb[3].mxu0  ;;  %v451_v57 = vpop.f32.mrb[3].mxu1 }
  0xf9   :  { %v322_v58 = vadd.f32 %v431_v52, %v74_v41  ;;  %v346_v59 = vadd.f32 %v449_v53, %v104_v47  ;;  %v434_v60 = vadd.f32 %v433_v56, %v432_v54  ;;  %v452_v61 = vadd.f32 %v451_v57, %v450_v55 }
  0xfb   :  { %369 = vst.msk [vmem:[%s713_s3] sm:$0xff] %vm368_vm0, %v322_v58  ;;  %375 = vst.msk [vmem:[%s713_s3 + $0x30] sm:$0xff] %vm368_vm0, %v346_v59  ;;  %v325_v63 = vadd.f32 %v434_v60, %v79_v43  ;;  %v349_v0 = vadd.f32 %v452_v61, %v109_v62 }
  0xfd   :  { %370 = vst.msk [vmem:[%s713_s3 + $0x8] sm:$0xff] %vm368_vm0, %v325_v63  ;;  %376 = vst.msk [vmem:[%s713_s3 + $0x38] sm:$0xff] %vm368_vm0, %v349_v0  ;;  %v435_v2 = vpop.f32.mrb[4].mxu0  ;;  %v453_v3 = vpop.f32.mrb[4].mxu1 }
  0xfe   :  { %v436_v4 = vpop.f32.mrb[5].mxu0  ;;  %v454_v5 = vpop.f32.mrb[5].mxu1 }
  0xff   :  { %v437_v6 = vadd.f32 %v436_v4, %v435_v2  ;;  %v455_v7 = vadd.f32 %v454_v5, %v453_v3  ;;  %v438_v8 = vpop.f32.mrb[6].mxu0  ;;  %v456_v9 = vpop.f32.mrb[6].mxu1 }
 0x100   :  { %v439_v10 = vpop.f32.mrb[7].mxu0  ;;  %v457_v11 = vpop.f32.mrb[7].mxu1 }
 0x101   :  { %v330_v12 = vadd.f32 %v437_v6, %v84_v42  ;;  %v354_v13 = vadd.f32 %v455_v7, %v114_v1  ;;  %v440_v14 = vadd.f32 %v439_v10, %v438_v8  ;;  %v458_v15 = vadd.f32 %v457_v11, %v456_v9 }
 0x103   :  { %371 = vst.msk [vmem:[%s713_s3 + $0x10] sm:$0xff] %vm368_vm0, %v330_v12  ;;  %377 = vst.msk [vmem:[%s713_s3 + $0x40] sm:$0xff] %vm368_vm0, %v354_v13  ;;  %v333_v17 = vadd.f32 %v440_v14, %v89_v44  ;;  %v357_v18 = vadd.f32 %v458_v15, %v119_v16 }
 0x105   :  { %372 = vst.msk [vmem:[%s713_s3 + $0x18] sm:$0xff] %vm368_vm0, %v333_v17  ;;  %378 = vst.msk [vmem:[%s713_s3 + $0x48] sm:$0xff] %vm368_vm0, %v357_v18  ;;  %v441_v20 = vpop.f32.mrb[8].mxu0  ;;  %v459_v21 = vpop.f32.mrb[8].mxu1 }
 0x106   :  { %v442_v22 = vpop.f32.mrb[9].mxu0  ;;  %v460_v23 = vpop.f32.mrb[9].mxu1 }
 0x107   :  { %v443_v24 = vadd.f32 %v442_v22, %v441_v20  ;;  %v461_v25 = vadd.f32 %v460_v23, %v459_v21  ;;  %v444_v26 = vpop.f32.mrb[10].mxu0  ;;  %v462_v27 = vpop.f32.mrb[10].mxu1 }
 0x108   :  { %v445_v28 = vpop.f32.mrb[11].mxu0  ;;  %v463_v29 = vpop.f32.mrb[11].mxu1 }
 0x109   :  { %v338_v30 = vadd.f32 %v443_v24, %v94_v45  ;;  %v362_v31 = vadd.f32 %v461_v25, %v124_v19  ;;  %v446_v32 = vadd.f32 %v445_v28, %v444_v26  ;;  %v464_v33 = vadd.f32 %v463_v29, %v462_v27 }
 0x10b   :  { %373 = vst.msk [vmem:[%s713_s3 + $0x20] sm:$0xff] %vm368_vm0, %v338_v30  ;;  %379 = vst.msk [vmem:[%s713_s3 + $0x50] sm:$0xff] %vm368_vm0, %v362_v31  ;;  %v341_v35 = vadd.f32 %v446_v32, %v659_v46  ;;  %v365_v36 = vadd.f32 %v464_v33, %v129_v34 }
 0x10d   :  { %374 = vst.msk [vmem:[%s713_s3 + $0x28] sm:$0xff] %vm368_vm0, %v341_v35  ;;  %380 = vst.msk [vmem:[%s713_s3 + $0x58] sm:$0xff] %vm368_vm0, %v365_v36 }

</bundles_post_ra>
